<compile_context>
chip_gen: v7x
topology: tpu7x:2x2x1
jax: 0.10.0
libtpu: 0.0.40
codegen_flags: <defaults>
</compile_context>

<pallas_src>
import functools

import jax
import jax.numpy as jnp
from jax.experimental import pallas as pl
from jax.experimental.pallas import tpu as pltpu


def _relative_pos_dis(height, width):
    """JAX port of relative_pos_dis(): (N, N) squared relative distances."""
    h = jnp.arange(height)
    w = jnp.arange(width)
    hh, ww = jnp.meshgrid(h, w, indexing="ij")
    coords = jnp.stack([hh.reshape(-1), ww.reshape(-1)], axis=0)      # (2, N)
    rel = coords[:, :, None] - coords[:, None, :]                     # (2, N, N)
    return ((rel[0].astype(jnp.float32) / height) ** 2
            + (rel[1].astype(jnp.float32) / width) ** 2)


def _attention_kernel(p_ref, w_ref, disw_ref, wo_ref, bo_ref, o_ref, acc_ref,
                      *, dim_head, smooth, tq):
    qi = pl.program_id(1)
    g = pl.program_id(2)
    n_heads = pl.num_programs(2)
    d = dim_head

    w = w_ref[...]                                                    # (3d, C9)  rows = [q; k; v]
    patches = p_ref[...]                                              # (C9, N)   spatial on lanes
    q_start = pl.multiple_of(qi * tq, tq)
    p_blk = p_ref[:, pl.ds(q_start, tq)]                              # (C9, TQ)  this query block

    # 3x3 conv (im2col matmul): k/v over all keys, q only over this query row-block.
    kvT = jnp.dot(w[d:, :], patches, preferred_element_type=jnp.float32)   # (2d, N)
    qT = jnp.dot(w[:d, :], p_blk, preferred_element_type=jnp.float32)      # (d, TQ)
    kT = kvT[:d, :]                                                         # (d, N)
    vT = kvT[d:, :]                                                         # (d, N)

    # Scores: contract the head-dim (axis 0 of both) so the MXU consumes qT without a
    # materialized (TQ, d) transpose.
    s = jax.lax.dot_general(qT, kT, (((0,), (0,)), ((), ())),
                            preferred_element_type=jnp.float32)             # (TQ, N)

    # L2 normalization (this module has no softmax) + precomputed gaussian weighting,
    # fused into a single elementwise pass with a reciprocal-multiply.
    qn = jnp.sqrt(jnp.sum(qT * qT, axis=0, keepdims=True) + smooth)         # (1, TQ)
    kn = jnp.sqrt(jnp.sum(kT * kT, axis=0, keepdims=True) + smooth)         # (1, N)
    den = jnp.transpose(qn) * kn + smooth                                   # (TQ, N)
    attn = s * pl.reciprocal(den, approx=True) * disw_ref[...]              # (TQ, N)

    # out^T (d, TQ) = v^T @ attn^T : contract the key axis (last of both).
    outT = jax.lax.dot_general(vT, attn, (((1,), (1,)), ((), ())),
                               preferred_element_type=jnp.float32)          # (d, TQ)

    # Stash this head's slice; the single output projection happens once in finalize.
    acc_ref[pl.ds(pl.multiple_of(g * d, d), d), :] = outT

    @pl.when(g == n_heads - 1)
    def _finalize():
        # 1x1 output conv (BN scale folded into wo) over ALL heads in one matmul.
        y = jnp.dot(wo_ref[...], acc_ref[...], preferred_element_type=jnp.float32)  # (C, TQ)
        rows = jax.lax.broadcasted_iota(jnp.int32, y.shape, 0)
        for c in range(y.shape[0]):              # static, small C: folded BN bias from SMEM
            y = jnp.where(rows == c, y + bo_ref[c], y)
        o_ref[...] = jnp.maximum(y, 0.0).astype(o_ref.dtype)


@functools.partial(jax.jit,
                   static_argnames=("heads", "dim_head", "smooth", "eps", "tq"))
def cnn_attention(x, w_qkv, headsita, w_out, bn_gamma, bn_beta, bn_mean, bn_var,
                  *, heads, dim_head, smooth=1e-4, eps=1e-5, tq=128):
    """Fused CNNAttention forward (train-mode output; eval-mode BN folding).

    x        : (B, dim, H, W) float32 (NCHW)
    w_qkv    : (3*heads*dim_head, dim, 3, 3)  3x3 conv weight (no bias)
    headsita : (heads,) per-head position-bandwidth parameter
    w_out    : (dim, heads*dim_head) 1x1 output conv weight (no bias)
    bn_*     : (dim,) BatchNorm2d params / running stats
    """
    B, C, H, W = x.shape
    N = H * W
    inner = heads * dim_head
    C9 = C * 9

    # Query-row tile (parallel grid axis); fall back to full N when it doesn't divide.
    if N % tq != 0:
        tq = N

    # --- im2col for the 3x3 same-padded conv: (B, C*9, N), spatial stays on lanes ---
    xp = jnp.pad(x, ((0, 0), (0, 0), (1, 1), (1, 1)))
    cols = [xp[:, :, dy:dy + H, dx:dx + W] for dy in range(3) for dx in range(3)]
    patches = jnp.stack(cols, axis=2).reshape(B, C9, N)               # (c, dy, dx) order

    # --- per-head QKV weights stacked as one (heads, 3*dim_head, C9) array ---
    w2 = w_qkv.reshape(3 * inner, C9)
    wq = w2[:inner].reshape(heads, dim_head, C9)
    wk = w2[inner:2 * inner].reshape(heads, dim_head, C9)
    wv = w2[2 * inner:].reshape(heads, dim_head, C9)
    w_stacked = jnp.concatenate([wq, wk, wv], axis=1)                 # (heads, 3d, C9)

    # --- per-head gaussian factor (only the 2nd assignment in the torch code is live) ---
    factor = 1.0 / (2.0 * (jax.nn.sigmoid(headsita) * (0.4 - 0.003) + 0.003) ** 2)

    # --- batch-invariant gaussian position weights, precomputed (review item #1) ---
    dis = _relative_pos_dis(H, W)                                     # (N, N)
    disw = jnp.exp(-factor[:, None, None].astype(jnp.float32) * dis[None])
    disw = (disw / jnp.sum(disw, axis=-1, keepdims=True)).astype(jnp.float32)   # (heads, N, N)

    # --- fold eval-mode BatchNorm into the 1x1 output projection ---
    bn_scale = bn_gamma / jnp.sqrt(bn_var + eps)
    bo = (bn_beta - bn_mean * bn_scale).astype(jnp.float32)           # (C,) -> SMEM
    wo = (w_out.reshape(C, inner) * bn_scale[:, None]).astype(jnp.float32)      # (C, inner)

    kernel = functools.partial(_attention_kernel, dim_head=dim_head,
                               smooth=float(smooth), tq=tq)

    out = pl.pallas_call(
        kernel,
        out_shape=jax.ShapeDtypeStruct((B, C, N), x.dtype),
        grid_spec=pltpu.PrefetchScalarGridSpec(
            num_scalar_prefetch=0,
            grid=(B, N // tq, heads),
            in_specs=[
                pl.BlockSpec((None, C9, N), lambda b, qi, g: (b, 0, 0)),            # patches
                pl.BlockSpec((None, 3 * dim_head, C9), lambda b, qi, g: (g, 0, 0)), # Wqkv stacked
                pl.BlockSpec((None, tq, N), lambda b, qi, g: (g, qi, 0)),           # disw row-block
                pl.BlockSpec((C, inner), lambda b, qi, g: (0, 0)),                  # Wout (BN-scaled)
                pl.BlockSpec(memory_space=pltpu.MemorySpace.SMEM),                  # folded BN bias
            ],
            out_specs=pl.BlockSpec((None, C, tq), lambda b, qi, g: (b, 0, qi)),
            scratch_shapes=[pltpu.VMEM((inner, tq), jnp.float32)],
        ),
        compiler_params=pltpu.CompilerParams(
            dimension_semantics=("parallel", "parallel", "arbitrary"),
        ),
    )(patches, w_stacked, disw, wo, bo)

    return out.reshape(B, C, H, W)                                     # free reshape, no transpose


def _reference(x, w_qkv, headsita, w_out, bn_gamma, bn_beta, bn_mean, bn_var,
               *, heads, dim_head, smooth=1e-4, eps=1e-5):
    """Pure-JAX port of CNNAttention.forward (mode='train', eval-mode BN)."""
    B, C, H, W = x.shape
    N = H * W
    inner = heads * dim_head
    hp = jax.lax.Precision.HIGHEST

    qkv = jax.lax.conv_general_dilated(
        x, w_qkv, window_strides=(1, 1), padding=((1, 1), (1, 1)),
        dimension_numbers=("NCHW", "OIHW", "NCHW"), precision=hp)
    q, k, v = jnp.split(qkv, 3, axis=1)

    def to_bgnd(t):  # 'b (g d) h w -> b g (h w) d'
        return t.reshape(B, heads, dim_head, N).transpose(0, 1, 3, 2)

    q, k, v = to_bgnd(q), to_bgnd(k), to_bgnd(v)

    attn = jnp.einsum("bgnd,bgmd->bgnm", q, k, precision=hp)
    qn = jnp.sqrt(jnp.sum(q * q, axis=-1) + smooth)
    kn = jnp.sqrt(jnp.sum(k * k, axis=-1) + smooth)
    attn = attn / (qn[:, :, :, None] * kn[:, :, None, :] + smooth)

    factor = 1.0 / (2.0 * (jax.nn.sigmoid(headsita) * (0.4 - 0.003) + 0.003) ** 2)
    dis = _relative_pos_dis(H, W)
    disw = jnp.exp(-factor[:, None, None] * dis[None, :, :])
    disw = disw / jnp.sum(disw, axis=-1, keepdims=True)
    attn = attn * disw[None]

    out = jnp.einsum("bgnm,bgmd->bgnd", attn, v, precision=hp)
    out = out.transpose(0, 1, 3, 2).reshape(B, inner, H, W)            # 'b g (h w) d -> b (g d) h w'

    y = jnp.einsum("oc,bchw->bohw", w_out, out, precision=hp)          # 1x1 conv, no bias
    s = bn_gamma / jnp.sqrt(bn_var + eps)
    y = y * s[None, :, None, None] + (bn_beta - bn_mean * s)[None, :, None, None]
    return jnp.maximum(y, 0.0)


if __name__ == "__main__":
    key = jax.random.PRNGKey(0)
    B, dim, H, W = 2, 4, 16, 16            # num_patches = H*W = 256
    heads, dim_head = 4, 64
    inner = heads * dim_head

    ks = jax.random.split(key, 8)
    x = jax.random.normal(ks[0], (B, dim, H, W), dtype=jnp.float32)
    w_qkv = 0.05 * jax.random.normal(ks[1], (3 * inner, dim, 3, 3), dtype=jnp.float32)
    headsita = jax.random.normal(ks[2], (heads,), dtype=jnp.float32)
    w_out = 0.05 * jax.random.normal(ks[3], (dim, inner), dtype=jnp.float32)
    bn_gamma = 1.0 + 0.1 * jax.random.normal(ks[4], (dim,), dtype=jnp.float32)
    bn_beta = 0.1 * jax.random.normal(ks[5], (dim,), dtype=jnp.float32)
    bn_mean = 0.05 * jax.random.normal(ks[6], (dim,), dtype=jnp.float32)
    bn_var = 1.0 + 0.1 * jnp.abs(jax.random.normal(ks[7], (dim,), dtype=jnp.float32))

    out = cnn_attention(x, w_qkv, headsita, w_out, bn_gamma, bn_beta, bn_mean, bn_var,
                        heads=heads, dim_head=dim_head)
    out = jax.block_until_ready(out)

    ref = _reference(x, w_qkv, headsita, w_out, bn_gamma, bn_beta, bn_mean, bn_var,
                     heads=heads, dim_head=dim_head)

    assert out.shape == (B, dim, H, W), out.shape
    max_err = float(jnp.max(jnp.abs(out - ref)))
    assert jnp.allclose(out, ref, atol=2e-3, rtol=2e-3), f"mismatch vs reference, max_abs_err={max_err}"
    print("KERNEL_OK")
</pallas_src>

<mosaic_0001>
module attributes {stable_mosaic.version = 11 : i64} {
  func.func @_attention_kernel(%arg0: i32, %arg1: i32, %arg2: i32, %arg3: memref<1x36x256xf32, #tpu.memory_space<vmem>>, %arg4: memref<1x192x36xf32, #tpu.memory_space<vmem>>, %arg5: memref<1x128x256xf32, #tpu.memory_space<vmem>>, %arg6: memref<4x256xf32, #tpu.memory_space<vmem>>, %arg7: memref<4xf32, #tpu.memory_space<smem>>, %arg8: memref<1x4x128xf32, #tpu.memory_space<vmem>>, %arg9: memref<256x128xf32, #tpu.memory_space<vmem>>) attributes {dimension_semantics = [#tpu.dimension_semantics<parallel>, #tpu.dimension_semantics<parallel>, #tpu.dimension_semantics<arbitrary>], iteration_bounds = array<i64: 2, 2, 4>, scalar_prefetch = 0 : i64, scratch_operands = 1 : i64, tpu.core_type = #tpu.core_type<tc>, window_params = [{transform_indices = @transform_0, window_bounds = array<i64: 1, 36, 256>}, {transform_indices = @transform_1, window_bounds = array<i64: 1, 192, 36>}, {transform_indices = @transform_2, window_bounds = array<i64: 1, 128, 256>}, {pipeline_mode = #tpu.pipeline_mode<synchronous>, transform_indices = @transform_3, window_bounds = array<i64: 4, 256>}, {transform_indices = @transform_4, window_bounds = array<i64: 4>}, {transform_indices = @transform_5, window_bounds = array<i64: 1, 4, 128>}]} {
    %c0 = arith.constant 0 : index
    %c0_0 = arith.constant 0 : index
    %c0_1 = arith.constant 0 : index
    %0 = vector.load %arg4[%c0, %c0_0, %c0_1] : memref<1x192x36xf32, #tpu.memory_space<vmem>>, vector<1x192x36xf32>
    %1 = vector.shape_cast %0 : vector<1x192x36xf32> to vector<192x36xf32>
    %c0_2 = arith.constant 0 : index
    %c0_3 = arith.constant 0 : index
    %c0_4 = arith.constant 0 : index
    %2 = vector.load %arg3[%c0_2, %c0_3, %c0_4] : memref<1x36x256xf32, #tpu.memory_space<vmem>>, vector<1x36x256xf32>
    %3 = vector.shape_cast %2 : vector<1x36x256xf32> to vector<36x256xf32>
    %c128_i32 = arith.constant 128 : i32
    %4 = arith.muli %arg1, %c128_i32 : i32
    %5 = tpu.assume_multiple %4, 128 : i32
    %c0_5 = arith.constant 0 : index
    %c0_6 = arith.constant 0 : index
    %6 = arith.index_cast %5 : i32 to index
    %7 = vector.load %arg3[%c0_5, %c0_6, %6] : memref<1x36x256xf32, #tpu.memory_space<vmem>>, vector<1x36x128xf32>
    %8 = vector.shape_cast %7 : vector<1x36x128xf32> to vector<36x128xf32>
    %9 = vector.extract_strided_slice %1 {offsets = [64, 0], sizes = [128, 36], strides = [1, 1]} : vector<192x36xf32> to vector<128x36xf32>
    %cst = arith.constant dense<0.000000e+00> : vector<128x256xf32>
    %10 = tpu.matmul %9, %3, %cst {dimension_numbers = #tpu.dot_dimension_numbers<[1], [0], [0], [1], [0, 0, 1, 1], [], []>} : vector<128x36xf32>, vector<36x256xf32>, vector<128x256xf32> -> vector<128x256xf32>
    %11 = vector.extract_strided_slice %1 {offsets = [0, 0], sizes = [64, 36], strides = [1, 1]} : vector<192x36xf32> to vector<64x36xf32>
    %cst_7 = arith.constant dense<0.000000e+00> : vector<64x128xf32>
    %12 = tpu.matmul %11, %8, %cst_7 {dimension_numbers = #tpu.dot_dimension_numbers<[1], [0], [0], [1], [0, 0, 1, 1], [], []>} : vector<64x36xf32>, vector<36x128xf32>, vector<64x128xf32> -> vector<64x128xf32>
    %13 = vector.extract_strided_slice %10 {offsets = [0, 0], sizes = [64, 256], strides = [1, 1]} : vector<128x256xf32> to vector<64x256xf32>
    %14 = vector.extract_strided_slice %10 {offsets = [64, 0], sizes = [64, 256], strides = [1, 1]} : vector<128x256xf32> to vector<64x256xf32>
    %cst_8 = arith.constant dense<0.000000e+00> : vector<128x256xf32>
    %15 = tpu.matmul %12, %13, %cst_8 {dimension_numbers = #tpu.dot_dimension_numbers<[0], [0], [1], [1], [0, 1, 1, 1], [], []>} : vector<64x128xf32>, vector<64x256xf32>, vector<128x256xf32> -> vector<128x256xf32>
    %16 = arith.mulf %12, %12 : vector<64x128xf32>
    %cst_9 = arith.constant dense<0.000000e+00> : vector<128xf32>
    %17 = vector.multi_reduction <add>, %16, %cst_9 [0] : vector<64x128xf32> to vector<128xf32>
    %18 = vector.shape_cast %17 : vector<128xf32> to vector<1x128xf32>
    %cst_10 = arith.constant 9.99999974E-5 : f32
    %19 = vector.broadcast %cst_10 : f32 to vector<1x128xf32>
    %20 = arith.addf %18, %19 : vector<1x128xf32>
    %21 = math.sqrt %20 : vector<1x128xf32>
    %22 = arith.mulf %13, %13 : vector<64x256xf32>
    %cst_11 = arith.constant dense<0.000000e+00> : vector<256xf32>
    %23 = vector.multi_reduction <add>, %22, %cst_11 [0] : vector<64x256xf32> to vector<256xf32>
    %24 = vector.shape_cast %23 : vector<256xf32> to vector<1x256xf32>
    %cst_12 = arith.constant 9.99999974E-5 : f32
    %25 = vector.broadcast %cst_12 : f32 to vector<1x256xf32>
    %26 = arith.addf %24, %25 : vector<1x256xf32>
    %27 = math.sqrt %26 : vector<1x256xf32>
    %28 = tpu.transpose %21, [1, 0] : vector<1x128xf32> -> vector<128x1xf32>
    %29 = vector.broadcast %28 : vector<128x1xf32> to vector<128x256xf32>
    %30 = vector.broadcast %27 : vector<1x256xf32> to vector<128x256xf32>
    %31 = arith.mulf %29, %30 : vector<128x256xf32>
    %cst_13 = arith.constant 9.99999974E-5 : f32
    %32 = vector.broadcast %cst_13 : f32 to vector<128x256xf32>
    %33 = arith.addf %31, %32 : vector<128x256xf32>
    %34 = tpu.reciprocal %33 {approx = true} : vector<128x256xf32> -> vector<128x256xf32>
    %35 = arith.mulf %15, %34 : vector<128x256xf32>
    %c0_14 = arith.constant 0 : index
    %c0_15 = arith.constant 0 : index
    %c0_16 = arith.constant 0 : index
    %36 = vector.load %arg5[%c0_14, %c0_15, %c0_16] : memref<1x128x256xf32, #tpu.memory_space<vmem>>, vector<1x128x256xf32>
    %37 = vector.shape_cast %36 : vector<1x128x256xf32> to vector<128x256xf32>
    %38 = arith.mulf %35, %37 : vector<128x256xf32>
    %cst_17 = arith.constant dense<0.000000e+00> : vector<64x128xf32>
    %39 = tpu.matmul %14, %38, %cst_17 {dimension_numbers = #tpu.dot_dimension_numbers<[1], [1], [0], [0], [0, 0, 1, 0], [], []>} : vector<64x256xf32>, vector<128x256xf32>, vector<64x128xf32> -> vector<64x128xf32>
    %c64_i32 = arith.constant 64 : i32
    %40 = arith.muli %arg2, %c64_i32 : i32
    %41 = tpu.assume_multiple %40, 64 : i32
    %42 = arith.index_cast %41 : i32 to index
    %c0_18 = arith.constant 0 : index
    %43 = vector.load %arg9[%42, %c0_18] : memref<256x128xf32, #tpu.memory_space<vmem>>, vector<64x128xf32>
    tpu.vector_store %arg9[%42, %c0_18], %39 {strides = array<i32>} : memref<256x128xf32, #tpu.memory_space<vmem>>, vector<64x128xf32>,
    %c3_i32 = arith.constant 3 : i32
    %44 = arith.cmpi eq, %arg2, %c3_i32 : i32
    %45 = arith.extui %44 : i1 to i32
    %c0_i32 = arith.constant 0 : i32
    %46 = arith.cmpi ne, %45, %c0_i32 : i32
    scf.if %46 {
      %c0_19 = arith.constant 0 : index
      %c0_20 = arith.constant 0 : index
      %47 = vector.load %arg6[%c0_19, %c0_20] : memref<4x256xf32, #tpu.memory_space<vmem>>, vector<4x256xf32>
      %c0_21 = arith.constant 0 : index
      %c0_22 = arith.constant 0 : index
      %48 = vector.load %arg9[%c0_21, %c0_22] : memref<256x128xf32, #tpu.memory_space<vmem>>, vector<256x128xf32>
      %cst_23 = arith.constant dense<0.000000e+00> : vector<4x128xf32>
      %49 = tpu.matmul %47, %48, %cst_23 {dimension_numbers = #tpu.dot_dimension_numbers<[1], [0], [0], [1], [0, 0, 1, 1], [], []>} : vector<4x256xf32>, vector<256x128xf32>, vector<4x128xf32> -> vector<4x128xf32>
      %50 = tpu.iota {dimensions = array<i32: 0>} : vector<4x128xi32>
      %c0_i32_24 = arith.constant 0 : i32
      %51 = vector.broadcast %c0_i32_24 : i32 to vector<4x128xi32>
      %52 = arith.cmpi eq, %50, %51 : vector<4x128xi32>
      %c0_25 = arith.constant 0 : index
      %53 = memref.load %arg7[%c0_25] : memref<4xf32, #tpu.memory_space<smem>>
      %54 = vector.broadcast %53 : f32 to vector<4x128xf32>
      %55 = arith.addf %49, %54 : vector<4x128xf32>
      %56 = arith.select %52, %55, %49 : vector<4x128xi1>, vector<4x128xf32>
      %c1_i32 = arith.constant 1 : i32
      %57 = vector.broadcast %c1_i32 : i32 to vector<4x128xi32>
      %58 = arith.cmpi eq, %50, %57 : vector<4x128xi32>
      %c1 = arith.constant 1 : index
      %59 = memref.load %arg7[%c1] : memref<4xf32, #tpu.memory_space<smem>>
      %60 = vector.broadcast %59 : f32 to vector<4x128xf32>
      %61 = arith.addf %56, %60 : vector<4x128xf32>
      %62 = arith.select %58, %61, %56 : vector<4x128xi1>, vector<4x128xf32>
      %c2_i32 = arith.constant 2 : i32
      %63 = vector.broadcast %c2_i32 : i32 to vector<4x128xi32>
      %64 = arith.cmpi eq, %50, %63 : vector<4x128xi32>
      %c2 = arith.constant 2 : index
      %65 = memref.load %arg7[%c2] : memref<4xf32, #tpu.memory_space<smem>>
      %66 = vector.broadcast %65 : f32 to vector<4x128xf32>
      %67 = arith.addf %62, %66 : vector<4x128xf32>
      %68 = arith.select %64, %67, %62 : vector<4x128xi1>, vector<4x128xf32>
      %c3_i32_26 = arith.constant 3 : i32
      %69 = vector.broadcast %c3_i32_26 : i32 to vector<4x128xi32>
      %70 = arith.cmpi eq, %50, %69 : vector<4x128xi32>
      %c3 = arith.constant 3 : index
      %71 = memref.load %arg7[%c3] : memref<4xf32, #tpu.memory_space<smem>>
      %72 = vector.broadcast %71 : f32 to vector<4x128xf32>
      %73 = arith.addf %68, %72 : vector<4x128xf32>
      %74 = arith.select %70, %73, %68 : vector<4x128xi1>, vector<4x128xf32>
      %cst_27 = arith.constant 0.000000e+00 : f32
      %75 = vector.broadcast %cst_27 : f32 to vector<4x128xf32>
      %76 = arith.maximumf %74, %75 : vector<4x128xf32>
      %c0_28 = arith.constant 0 : index
      %c0_29 = arith.constant 0 : index
      %c0_30 = arith.constant 0 : index
      %77 = vector.load %arg8[%c0_28, %c0_29, %c0_30] : memref<1x4x128xf32, #tpu.memory_space<vmem>>, vector<1x4x128xf32>
      %78 = vector.shape_cast %77 : vector<1x4x128xf32> to vector<4x128xf32>
      %79 = vector.shape_cast %76 : vector<4x128xf32> to vector<1x4x128xf32>
      tpu.vector_store %arg8[%c0_28, %c0_29, %c0_30], %79 {strides = array<i32>} : memref<1x4x128xf32, #tpu.memory_space<vmem>>, vector<1x4x128xf32>,
    } else {
    }
    return
  }
  func.func @transform_0(%arg0: i32, %arg1: i32, %arg2: i32) -> (i32, i32, i32) {
    %c0_i32 = arith.constant 0 : i32
    %c0_i32_0 = arith.constant 0 : i32
    %c0_i32_1 = arith.constant 0 : i32
    return %arg0, %c0_i32, %c0_i32_0 : i32, i32, i32
  }
  func.func @transform_1(%arg0: i32, %arg1: i32, %arg2: i32) -> (i32, i32, i32) {
    %c0_i32 = arith.constant 0 : i32
    %c0_i32_0 = arith.constant 0 : i32
    %c0_i32_1 = arith.constant 0 : i32
    return %arg2, %c0_i32, %c0_i32_0 : i32, i32, i32
  }
  func.func @transform_2(%arg0: i32, %arg1: i32, %arg2: i32) -> (i32, i32, i32) {
    %c0_i32 = arith.constant 0 : i32
    %c0_i32_0 = arith.constant 0 : i32
    return %arg2, %arg1, %c0_i32 : i32, i32, i32
  }
  func.func @transform_3(%arg0: i32, %arg1: i32, %arg2: i32) -> (i32, i32) {
    %c0_i32 = arith.constant 0 : i32
    %c0_i32_0 = arith.constant 0 : i32
    %c0_i32_1 = arith.constant 0 : i32
    return %c0_i32, %c0_i32_0 : i32, i32
  }
  func.func @transform_4(%arg0: i32, %arg1: i32, %arg2: i32) -> i32 {
    %c0_i32 = arith.constant 0 : i32
    %c0_i32_0 = arith.constant 0 : i32
    return %c0_i32 : i32
  }
  func.func @transform_5(%arg0: i32, %arg1: i32, %arg2: i32) -> (i32, i32, i32) {
    %c0_i32 = arith.constant 0 : i32
    %c0_i32_0 = arith.constant 0 : i32
    return %arg0, %c0_i32, %arg1 : i32, i32, i32
  }
}

</mosaic_0001>

<bundles_post_ra>
// kernel: cnn_attention.1
= control target key start
LH: loop header
LB: loop body
LE: loop exit
PB: predicated region body
PF: predicated region fallthrough
CT: control target
= control target key end

     0   :  { %10 = vsyncpa [#allocation4], 0  ;;  %s2237_s18 = smov 0   ;;  %s2239_s19 = smov 0   ;;  %s2593_s0 = inlined_call_operand.vmem [shape: f32[2,36,256], index: 0, kind: input, shape index: {}]   ;;  %s2594_s1 = inlined_call_operand.vmem [shape: f32[4,192,36], index: 1, kind: input, shape index: {}]   ;;  %s2595_s2 = inlined_call_operand.vmem [shape: f32[4,256,256], index: 2, kind: input, shape index: {}]   ;;  %s2596_s3 = inlined_call_operand.vmem [shape: f32[4,256], index: 3, kind: input, shape index: {}]   ;;  %s2597_s4 = inlined_call_operand.vmem [shape: f32[4], index: 4, kind: input, shape index: {}]   ;;  %s2598_s5 = inlined_call_operand.vmem [shape: f32[2,4,256], index: 5, kind: output, shape index: {}]  }
   0x1   :  { %s2241_s20 = smov 0   ;;  %s2243_s21 = smov 0  }
   0x2   :  { %s2245_s22 = smov 0   ;;  %s2247_s23 = smov 0  }
   0x3   :  { %s2249_s24 = smov 0  }
   0x4 LB: > { %s1736_s25 = sadd.s32 4294967295, %s2202_s24   ;;  %s28_s26 = sadd.s32 1, %s2190_s21  ;;  %s2202_s24 = sphi %s2249_s24, %s16_s24   ;;  %s2198_s23 = sphi %s2247_s23, %s2606_s23   ;;  %s2194_s22 = sphi %s2245_s22, %s2605_s22   ;;  %s2190_s21 = sphi %s2243_s21, %s2604_s21   ;;  %s2186_s20 = sphi %s2241_s20, %s2603_s20   ;;  %s2182_s19 = sphi %s2239_s19, %s2602_s19   ;;  %s2178_s18 = sphi %s2237_s18, %s2601_s18  }
   0x5   : > { %p29_p0 = scmp.ge.s32.totalorder %s28_s26, 4  ;;  %s31_s27 = sadd.s32 1, %s2194_s22 }
   0x6   : > { %s35_s28 = sadd.s32 1, %s2198_s23  ;;  %p1738_p1 = scmp.ge.s32.totalorder %s2202_s24, 1 }
   0x7   : > { %s2608_s26 = smov (%p29_p0, %s28_s26), 0  ;;  %s2610_s27 = smov (!%p29_p0, %s31_s27), %s2194_s22 }
   0x8   : > { %p190_p2 = scmp.lt.s32.totalorder %s2202_s24, 17  ;;  %p33_p3 = scmp.ge.s32.totalorder %s2610_s27, 2 }
   0x9   : > { %p2281_p4 = scmp.eq.s32.totalorder %s1736_s25, 0  ;;  %s206_s8 = sshll.u32 %s2597_s4, 4  ;;  %s207_s8 = int_to_ptr.vmem [resolvable:$true] %s206_s8 }
   0xa   : > { %p2285_p5 = pnand %p1738_p1, %p190_p2  ;;  %s2612_s27 = smov (%p33_p3, %s2610_s27), 0 }
   0xb   : > { %s2614_s28 = smov (!%p33_p3, %s35_s28), %s2198_s23  ;;  %s2129_s9 = scalar_lea.vmem %s207_s8, 16 }
   0xc   : > { %p1991_p6 = pneg %p2285_p5  ;;  %p37_p7 = scmp.ge.s32.totalorder %s2614_s28, 2 }
   0xd   : > { %p2130_p9 = scmp.ne.s32.totalorder %s207_s8, %s2129_s9  ;;  %p2137_p13 = scmp.lt.s32.totalorder %s207_s8, %s207_s8 }
   0xe   : > { %p1992_p8 = pnand %p2281_p4, %p1991_p6  ;;  %s2616_s28 = smov (%p37_p7, %s2614_s28), 0 }
   0xf   : > { %p2138_p0 = scmp.lt.s32.totalorder %s2129_s9, %s2129_s9 }
  0x10   : > { %p2131_p10 = pneg %p1992_p8 }
  0x11   : > { %p2139_p1 = por %p2138_p0, %p2137_p13 }
  0x12   : > { %p2132_p11 = pnand %p2131_p10, %p2130_p9 }
  0x14   : > { %p2133_p12 = pneg %p2132_p11 }
  0x16   : > { %p2140_p2 = pnand %p2139_p1, %p2133_p12 }
  0x18   : > { %2143 = shalt.err (!%p2140_p2)
}
  0x19   : > { %s2204_s10 = smov [#allocation3]   ;;  %249 = sbr.rel (%p2285_p5) target bundleno = 1190 (0x4a6), region = 40 }
  0x1a   : > { %1994 = dma.vmem_to_smem (!%p1992_p8), %s207_s8, 16, %s2204_s10, [#allocation4]  }
  0x20   : > { %2173 = dma.done.wait (%p2281_p4), [#allocation4], 16  }
  0x21   : > { %2175 = vsyncadd (%p2281_p4), [#allocation4], 4294967280 }
  0x22   : > { %255 = sfence }
  0x23   : > { %p296_p3 = scmp.lt.s32.totalorder %s2186_s20, 1  ;;  %p319_p6 = scmp.lt.s32.totalorder %s2182_s19, 1  ;;  %v2205_v0 = vmov 0.0   ;;  %vm369_vm0 = vcmask 293888   ;;  %vm418_vm1 = vcmask 1043456   ;;  %vm750_vm4 = vcmask 523264  }
  0x24   : > { %s1751_s11 = sshll.u32 %s2182_s19, 7  ;;  %p301_p7 = scmp.lt.s32.totalorder %s2178_s18, 3  ;;  %489 = vmatprep.mubr.f32.mxu0 %v2205_v0 }
  0x25   : > { %s2618_s20 = smov (!%p296_p3, %s2186_s20), 1  ;;  %s360_s16 = sshra.s32 %s1751_s11, 7 }
  0x26   : > { %s320_s12 = scalar_select %p319_p6, %s2182_s19, 1 }
  0x27   : > { %s1985_s13 = smul.u32 80, %s2618_s20  ;;  %s1749_s14 = sshll.u32 %s2618_s20, 1 }
  0x28   : > { %s322_s15 = sadd.s32 %s1749_s14, %s320_s12  ;;  %s1752_s8 = sshll.u32 %s360_s16, 3 }
  0x29   : > { %s2317_s29 = scalar_lea.vmem %s2593_s0, %s1985_s13  ;;  %s1750_s30 = sshll.u32 %s322_s15, 2 }
  0x2a   : > { %s2322_s20 = scalar_lea.vmem %s2598_s5, %s1750_s30  ;;  %v350_v1 = vld [vmem:[%s2317_s29 + $0x8] sm:$0xff]  ;;  %v352_v2 = vld [vmem:[%s2317_s29 + $0x18] sm:$0xff]  ;;  %v349_v3 = vld [vmem:[%s2317_s29] sm:$0xff]  ;;  %s363_s9 = scalar_lea.vmem %s2317_s29, %s1752_s8 }
  0x2b   : > { %v1873_v4 = vpack.c.bf16 %v352_v2, %v350_v1  ;;  %v351_v5 = vld [vmem:[%s2317_s29 + $0x10] sm:$0xff]  ;;  %v354_v6 = vld [vmem:[%s2317_s29 + $0x28] sm:$0xff]  ;;  %v356_v7 = vld [vmem:[%s2317_s29 + $0x38] sm:$0xff]  ;;  %s2334_s10 = scalar_select %p301_p7, %s2178_s18, 3 }
  0x2c   : > { %v364_v8 = vld [vmem:[%s363_s9] sm:$0xff]  ;;  %v365_v9 = vld [vmem:[%s363_s9 + $0x10] sm:$0xff]  ;;  %v1875_v11 = vpack.c.bf16 %v351_v5, %v349_v3  ;;  %v1877_v12 = vpack.c.bf16 %v356_v7, %v354_v6  ;;  %v358_v19 = vld [vmem:[%s2317_s29 + $0x48] sm:$0xf]  ;;  %s1745_s15 = sshll.u32 %s2182_s19, 4  ;;  %s1796_s7 = sshll.u32 %s2178_s18, 6 }
  0x2d   : > { %v366_v10 = vld [vmem:[%s363_s9 + $0x20] sm:$0xff]  ;;  %v1881_v13 = vpack.c.bf16 %v365_v9, %v364_v8  ;;  %v367_v14 = vld [vmem:[%s363_s9 + $0x30] sm:$0xff]  ;;  %1874 = vmatprep.subr.bf16.mxu0 %v1873_v4  ;;  %s1986_s11 = smul.u32 192, %s2334_s10  ;;  %p309_p4 = scmp.lt.s32.totalorder %s1745_s15, 31 }
  0x2e   : > { %v353_v15 = vld [vmem:[%s2317_s29 + $0x20] sm:$0xff]  ;;  %v1885_v16 = vpack.c.bf16 %v367_v14, %v366_v10  ;;  %1876 = vmatpush1.bf16.msra.mxu0 %v1875_v11  ;;  %v355_v17 = vld [vmem:[%s2317_s29 + $0x30] sm:$0xff]  ;;  %s1747_s16 = sshll.u32 %s2334_s10, 6  ;;  %s1457_s8 = scalar_lea.vmem [#allocation2], %s1796_s7 }
  0x2f   : > { %1882 = vmatprep.subr.bf16.mxu1 %v1881_v13  ;;  %1878 = vmatprep.subr.bf16.mxu0 %v1877_v12  ;;  %v1879_v18 = vpack.c.bf16 %v355_v17, %v353_v15  ;;  %s2342_s14 = scalar_lea.vmem %s2594_s1, %s1986_s11  ;;  %v368_v21 = vld [vmem:[%s363_s9 + $0x40] sm:$0xf]  ;;  %s2620_s15 = smov (!%p309_p4, %s1745_s15), 31 }
  0x30   : > { %1884 = vmatpush3.bf16.msra.mxu1 %v1881_v13  ;;  %v325_v20 = vld [vmem:[%s2342_s14] sm:$0xff]  ;;  %v326_v24 = vld [vmem:[%s2342_s14 + $0x8] sm:$0xff]  ;;  %v327_v25 = vld [vmem:[%s2342_s14 + $0x10] sm:$0xff]  ;;  %s1746_s19 = sshll.u32 %s2620_s15, 1  ;;  %p1797_p5 = scmp.ne.s32.totalorder %s2178_s18, 3 }
  0x31   : > { %1886 = vmatprep.subr.bf16.mxu1 %v1885_v16  ;;  %1861 = vmatprep.mubr.msk.f32.mxu1 %vm369_vm0, %v325_v20  ;;  %v357_v22 = vld [vmem:[%s2317_s29 + $0x40] sm:$0xf]  ;;  %v334_v26 = vld [vmem:[%s2342_s14 + $0x48] sm:$0xff]  ;;  %v328_v27 = vld [vmem:[%s2342_s14 + $0x18] sm:$0xff]  ;;  %s313_s17 = sadd.s32 %s1747_s16, %s1746_s19  ;;  %s1579_s10 = sld [smem:[#allocation3]] (!%p1797_p5) }
  0x32   : > { %1880 = vmatpush1.bf16.msra.mxu0 %v1879_v18  ;;  %v333_v23 = vld [vmem:[%s2342_s14 + $0x40] sm:$0xff]  ;;  %v335_v29 = vld [vmem:[%s2342_s14 + $0x50] sm:$0xff]  ;;  %v330_v30 = vld [vmem:[%s2342_s14 + $0x28] sm:$0xff]  ;;  %s1748_s25 = sshll.u32 %s313_s17, 3  ;;  %s1798_s11 = sld [smem:[#allocation3 + $0x1]] (!%p1797_p5) }
  0x33   : > { %1753 = vmatprep.subr.msk.mxu0 %vm418_vm1, %v358_v19  ;;  %v329_v28 = vld [vmem:[%s2342_s14 + $0x20] sm:$0xff]  ;;  %v331_v31 = vld [vmem:[%s2342_s14 + $0x30] sm:$0xff]  ;;  %v336_v32 = vld [vmem:[%s2342_s14 + $0x58] sm:$0xff]  ;;  %s2494_s6 = scalar_lea.vmem %s2595_s2, %s1748_s25  ;;  %s1799_s12 = sld [smem:[#allocation3 + $0x2]] (!%p1797_p5) }
  0x34   : > { %1888 = vmatpush3.bf16.msra.mxu1 %v1885_v16  ;;  %v332_v33 = vld [vmem:[%s2342_s14 + $0x38] sm:$0xff]  ;;  %v337_v34 = vld [vmem:[%s2342_s14 + $0x60] sm:$0xff]  ;;  %v338_v35 = vld [vmem:[%s2342_s14 + $0x68] sm:$0xff]  ;;  %s1800_s13 = sld [smem:[#allocation3 + $0x3]] (!%p1797_p5) }
  0x35   : > { %1859 = vmatprep.subr.msk.mxu1 %vm418_vm1, %v368_v21  ;;  %v339_v36 = vld [vmem:[%s2342_s14 + $0x70] sm:$0xff]  ;;  %v340_v37 = vld [vmem:[%s2342_s14 + $0x78] sm:$0xff] }
  0x36   : > { %1754 = vmatpush1.msk.msra.mxu0 %vm418_vm1, %v357_v22 }
  0x37   : > { %1755 = vmatmul.mubr.msk.f32.vlgmr.msra.gmra.mrb[0].mxu0 %vm369_vm0, %v333_v23 }
  0x38   : > { %1860 = vmatpush3.msk.msra.mxu1 %vm418_vm1, %v368_v21  ;;  %495 = vmatprep.mubr.f32.mxu0 %v2205_v0 }
  0x39   : > { %1862 = vmatmul.mubr.msk.f32.vlgmr.msra.gmra.mrb[0].mxu1 %vm369_vm0, %v326_v24 }
  0x3a   : > { %1864 = vmatprep.mubr.msk.f32.mxu1 %vm369_vm0, %v327_v25 }
  0x3b   : > { %1756 = vmatmul.mubr.msk.f32.gmra.mrb[2].mxu0 %vm369_vm0, %v334_v26 }
  0x3c   : > { %501 = vmatprep.mubr.f32.mxu0 %v2205_v0 }
  0x3d   : > { %1865 = vmatmul.mubr.msk.f32.gmra.mrb[2].mxu1 %vm369_vm0, %v328_v27 }
  0x3e   : > { %1867 = vmatprep.mubr.msk.f32.mxu1 %vm369_vm0, %v329_v28 }
  0x3f   : > { %1757 = vmatmul.mubr.msk.f32.gmra.mrb[4].mxu0 %vm369_vm0, %v335_v29 }
  0x40   : > { %507 = vmatprep.mubr.f32.mxu0 %v2205_v0 }
  0x41   : > { %1868 = vmatmul.mubr.msk.f32.gmra.mrb[4].mxu1 %vm369_vm0, %v330_v30 }
  0x42   : > { %1870 = vmatprep.mubr.msk.f32.mxu1 %vm369_vm0, %v331_v31 }
  0x43   : > { %1758 = vmatmul.mubr.msk.f32.gmra.mrb[6].mxu0 %vm369_vm0, %v336_v32 }
  0x44   : > { %513 = vmatprep.mubr.f32.mxu0 %v2205_v0 }
  0x45   : > { %1871 = vmatmul.mubr.msk.f32.gmra.mrb[6].mxu1 %vm369_vm0, %v332_v33 }
  0x46   : > { %863 = vmatprep.mubr.f32.mxu1 %v2205_v0 }
  0x47   : > { %1759 = vmatmul.mubr.msk.f32.gmra.mrb[8].mxu0 %vm369_vm0, %v337_v34 }
  0x48   : > { %519 = vmatprep.mubr.f32.mxu0 %v2205_v0 }
  0x4b   : > { %1760 = vmatmul.mubr.msk.f32.gmra.mrb[10].mxu0 %vm369_vm0, %v338_v35 }
  0x4c   : > { %525 = vmatprep.mubr.f32.mxu0 %v2205_v0 }
  0x4f   : > { %1761 = vmatmul.mubr.msk.f32.gmra.mrb[12].mxu0 %vm369_vm0, %v339_v36 }
  0x50   : > { %531 = vmatprep.mubr.f32.mxu0 %v2205_v0 }
  0x53   : > { %1762 = vmatmul.mubr.msk.f32.gmra.mrb[14].mxu0 %vm369_vm0, %v340_v37 }
  0x54   : > { %537 = vmatprep.mubr.f32.mxu0 %v2205_v0 }
 0x10a   : > { %v491_v38 = vpop.f32.mrb[0].mxu0 }
 0x10b   : > { %v493_v39 = vpop.f32.mrb[1].mxu0  ;;  %v989_v43 = vmul.f32 %v491_v38, %v491_v38 }
 0x10c   : > { %v1863_v40 = vpop.f32.mrb[0].mxu1  ;;  %v990_v45 = vmul.f32 %v493_v39, %v493_v39 }
 0x10d   : > { %v961_v41 = vmul.f32 %v1863_v40, %v1863_v40  ;;  %v679_v42 = vpop.f32.mrb[1].mxu1 }
 0x10e   : > { %v960_v44 = vmul.f32 %v679_v42, %v679_v42  ;;  %718 = vxpose.xlu0.b32.start [1/8] (short) %v679_v42, 128  ;;  %v497_v46 = vpop.f32.mrb[2].mxu0 }
 0x10f   : > { %v1891_v47 = vpack.c.bf16 %v497_v46, %v491_v38  ;;  %v991_v48 = vmul.f32 %v497_v46, %v497_v46  ;;  %v499_v49 = vpop.f32.mrb[3].mxu0 }
 0x110   : > { %v968_v50 = vadd.f32 %v961_v41, %v960_v44  ;;  %v1866_v51 = vpop.f32.mrb[2].mxu1  ;;  %v1889_v52 = vpack.c.bf16 %v499_v49, %v493_v39  ;;  %v992_v53 = vmul.f32 %v499_v49, %v499_v49 }
 0x111   : > { %v689_v54 = vpop.f32.mrb[3].mxu1  ;;  %v1005_v55 = vadd.f32 %v991_v48, %v989_v43  ;;  %v963_v56 = vmul.f32 %v1866_v51, %v1866_v51 }
 0x112   : > { %v962_v57 = vmul.f32 %v689_v54, %v689_v54  ;;  %719 = vxpose.xlu0.b32.cont [2/8] (short) %v1863_v40, 128  ;;  %v1018_v58 = vadd.f32 %v992_v53, %v990_v45  ;;  %v503_v59 = vpop.f32.mrb[4].mxu0  ;;  %1890 = vmatprep.subr.bf16.mxu1 %v1889_v52 }
 0x113   : > { %v993_v60 = vmul.f32 %v503_v59, %v503_v59  ;;  %v505_v61 = vpop.f32.mrb[5].mxu0  ;;  %1892 = vmatpush1.bf16.msra.mxu1 %v1891_v47 }
 0x114   : > { %v969_v62 = vadd.f32 %v968_v50, %v962_v57  ;;  %v1869_v63 = vpop.f32.mrb[4].mxu1  ;;  %v994_v1 = vmul.f32 %v505_v61, %v505_v61 }
 0x115   : > { %v699_v2 = vpop.f32.mrb[5].mxu1  ;;  %v1006_v3 = vadd.f32 %v1005_v55, %v993_v60  ;;  %v965_v4 = vmul.f32 %v1869_v63, %v1869_v63 }
 0x116   : > { %v964_v5 = vmul.f32 %v699_v2, %v699_v2  ;;  %v970_v6 = vadd.f32 %v969_v62, %v963_v56  ;;  %720 = vxpose.xlu0.b32.cont [3/8] (short) %v689_v54, 128  ;;  %v1019_v7 = vadd.f32 %v1018_v58, %v994_v1  ;;  %v509_v8 = vpop.f32.mrb[6].mxu0  ;;  %v341_v1 = vld [vmem:[%s2342_s14 + $0x80] sm:$0xff] }
 0x117   : > { %v1895_v9 = vpack.c.bf16 %v509_v8, %v503_v59  ;;  %v995_v10 = vmul.f32 %v509_v8, %v509_v8  ;;  %v511_v11 = vpop.f32.mrb[7].mxu0  ;;  %1763 = vmatmul.mubr.msk.f32.gmra.mrb[16].mxu0 %vm369_vm0, %v341_v1  ;;  %v347_v8 = vld [vmem:[%s2342_s14 + $0xb0] sm:$0xff] }
 0x118   : > { %v971_v12 = vadd.f32 %v970_v6, %v964_v5  ;;  %v1872_v13 = vpop.f32.mrb[6].mxu1  ;;  %v1893_v14 = vpack.c.bf16 %v511_v11, %v505_v61  ;;  %v996_v15 = vmul.f32 %v511_v11, %v511_v11  ;;  %543 = vmatprep.mubr.f32.mxu0 %v2205_v0  ;;  %v344_v5 = vld [vmem:[%s2342_s14 + $0x98] sm:$0xff]  ;;  %v345_v6 = vld [vmem:[%s2342_s14 + $0xa0] sm:$0xff] }
 0x119   : > { %v967_v16 = vmul.f32 %v1872_v13, %v1872_v13  ;;  %v709_v17 = vpop.f32.mrb[7].mxu1  ;;  %v1007_v18 = vadd.f32 %v1006_v3, %v995_v10  ;;  %v2206_v3 = vmov 0  }
 0x11a   : > { %v966_v19 = vmul.f32 %v709_v17, %v709_v17  ;;  %v972_v20 = vadd.f32 %v971_v12, %v965_v4  ;;  %721 = vxpose.xlu0.b32.cont [4/8] (short) %v1866_v51, 128  ;;  %v1020_v21 = vadd.f32 %v1019_v7, %v996_v15  ;;  %v515_v22 = vpop.f32.mrb[8].mxu0  ;;  %1894 = vmatprep.subr.bf16.mxu1 %v1893_v14  ;;  %v343_v4 = vld [vmem:[%s2342_s14 + $0x90] sm:$0xff]  ;;  %v346_v7 = vld [vmem:[%s2342_s14 + $0xa8] sm:$0xff] }
 0x11b   : > { %v997_v23 = vmul.f32 %v515_v22, %v515_v22  ;;  %v517_v24 = vpop.f32.mrb[9].mxu0  ;;  %1896 = vmatpush1.bf16.msra.mxu1 %v1895_v9  ;;  %v348_v9 = vld [vmem:[%s2342_s14 + $0xb8] sm:$0xff] }
 0x11c   : > { %v973_v25 = vadd.f32 %v972_v20, %v966_v19  ;;  %v998_v26 = vmul.f32 %v517_v24, %v517_v24 }
 0x11d   : > { %v1008_v27 = vadd.f32 %v1007_v18, %v997_v23 }
 0x11e   : > { %v974_v28 = vadd.f32 %v973_v25, %v967_v16  ;;  %722 = vxpose.xlu0.b32.cont [5/8] (short) %v699_v2, 128  ;;  %v1021_v29 = vadd.f32 %v1020_v21, %v998_v26  ;;  %v521_v30 = vpop.f32.mrb[10].mxu0  ;;  %v342_v2 = vld [vmem:[%s2342_s14 + $0x88] sm:$0xff] }
 0x11f   : > { %v1899_v31 = vpack.c.bf16 %v521_v30, %v515_v22  ;;  %v999_v32 = vmul.f32 %v521_v30, %v521_v30  ;;  %v523_v33 = vpop.f32.mrb[11].mxu0  ;;  %1764 = vmatmul.mubr.msk.f32.gmra.mrb[18].mxu0 %vm369_vm0, %v342_v2 }
 0x120   : > { %v975_v34 = vrot.slane %v974_v28, 4  ;;  %v1897_v35 = vpack.c.bf16 %v523_v33, %v517_v24  ;;  %v1000_v36 = vmul.f32 %v523_v33, %v523_v33  ;;  %549 = vmatprep.mubr.f32.mxu0 %v2205_v0 }
 0x121   : > { %v1009_v37 = vadd.f32 %v1008_v27, %v999_v32 }
 0x122   : > { %v976_v38 = vadd.f32 %v975_v34, %v974_v28  ;;  %723 = vxpose.xlu0.b32.cont [6/8] (short) %v1869_v63, 128  ;;  %v1022_v39 = vadd.f32 %v1021_v29, %v1000_v36  ;;  %v527_v40 = vpop.f32.mrb[12].mxu0  ;;  %1898 = vmatprep.subr.bf16.mxu1 %v1897_v35 }
 0x123   : > { %v1001_v41 = vmul.f32 %v527_v40, %v527_v40  ;;  %v529_v42 = vpop.f32.mrb[13].mxu0  ;;  %1900 = vmatpush1.bf16.msra.mxu1 %v1899_v31  ;;  %1765 = vmatmul.mubr.msk.f32.gmra.mrb[20].mxu0 %vm369_vm0, %v343_v4 }
 0x124   : > { %v977_v43 = vrot.slane %v976_v38, 2  ;;  %v1002_v44 = vmul.f32 %v529_v42, %v529_v42  ;;  %555 = vmatprep.mubr.f32.mxu0 %v2205_v0 }
 0x125   : > { %v1010_v45 = vadd.f32 %v1009_v37, %v1001_v41 }
 0x126   : > { %v978_v46 = vadd.f32 %v977_v43, %v976_v38  ;;  %724 = vxpose.xlu0.b32.cont [7/8] (short) %v709_v17, 128  ;;  %v1023_v47 = vadd.f32 %v1022_v39, %v1002_v44  ;;  %v533_v48 = vpop.f32.mrb[14].mxu0 }
 0x127   : > { %v1903_v49 = vpack.c.bf16 %v533_v48, %v527_v40  ;;  %v1003_v50 = vmul.f32 %v533_v48, %v533_v48  ;;  %v535_v51 = vpop.f32.mrb[15].mxu0  ;;  %1766 = vmatmul.mubr.msk.f32.gmra.mrb[22].mxu0 %vm369_vm0, %v344_v5 }
 0x128   : > { %v979_v52 = vrot.slane %v978_v46, 1  ;;  %v1901_v53 = vpack.c.bf16 %v535_v51, %v529_v42  ;;  %v1004_v54 = vmul.f32 %v535_v51, %v535_v51  ;;  %561 = vmatprep.mubr.f32.mxu0 %v2205_v0 }
 0x129   : > { %v2387_v55 = vadd.f32 %v1010_v45, %v1003_v50 }
 0x12a   : > { %v980_v56 = vadd.f32 %v979_v52, %v978_v46  ;;  %725 = vxpose.xlu0.b32.end [8/8] (short) %v1872_v13, 128  ;;  %v2389_v57 = vadd.f32 %v1023_v47, %v1004_v54  ;;  %1902 = vmatprep.subr.bf16.mxu1 %v1901_v53 }
 0x12b   : > { %1904 = vmatpush1.bf16.msra.mxu1 %v1903_v49  ;;  %1767 = vmatmul.mubr.msk.f32.gmra.mrb[24].mxu0 %vm369_vm0, %v345_v6  ;;  %v1012_v41 = vrot.slane %v2387_v55, 4 }
 0x12c   : > { %v981_v58 = vadd.f32 0.0001, %v980_v56  ;;  %567 = vmatprep.mubr.f32.mxu0 %v2205_v0  ;;  %v1025_v42 = vrot.slane %v2389_v57, 4 }
 0x12d   : > { %v1013_v43 = vadd.f32 %v1012_v41, %v2387_v55 }
 0x12e   : > { %2058 = vrsqrt.f32 %v981_v58  ;;  %vm984_vm2 = vcmp.eq.f32.partialorder %v981_v58, inf  ;;  %v987_v61 = vand.u32 2147483648, %v981_v58  ;;  %vm986_vm3 = vcmp.eq.f32.partialorder %v981_v58, 0.0 }
 0x12f   : > { %1768 = vmatmul.mubr.msk.f32.gmra.mrb[26].mxu0 %vm369_vm0, %v346_v7  ;;  %v1026_v45 = vadd.f32 %v1025_v42, %v2389_v57  ;;  %v1014_v48 = vrot.slane %v1013_v43, 2 }
 0x130   : > { %573 = vmatprep.mubr.f32.mxu0 %v2205_v0 }
 0x131   : > { %v1027_v50 = vrot.slane %v1026_v45, 2  ;;  %v1015_v53 = vadd.f32 %v1014_v48, %v1013_v43  ;;  %v1287_v43 = vld [vmem:[%s2494_s6] sm:$0xff] }
 0x133   : > { %1769 = vmatmul.mubr.msk.f32.gmra.mrb[28].mxu0 %vm369_vm0, %v347_v8  ;;  %v1028_v54 = vadd.f32 %v1027_v50, %v1026_v45  ;;  %v1016_v55 = vrot.slane %v1015_v53, 1 }
 0x134   : > { %579 = vmatprep.mubr.f32.mxu0 %v2205_v0 }
 0x135   : > { %v1029_v57 = vrot.slane %v1028_v54, 1 }
 0x137   : > { %1770 = vmatmul.mubr.msk.f32.gmra.mrb[30].mxu0 %vm369_vm0, %v348_v9 }
 0x138   : > { %v2059_v59 = vpop.eup %2058 }
 0x139   : > { %v983_v60 = vmul.f32 %v2059_v59, %v981_v58 }
 0x13b   : > { %v985_v62 = vsel %vm984_vm2, %v981_v58, %v983_v60  ;;  %v1017_v60 = vadd.f32 %v1016_v55, %v1015_v53  ;;  %v1288_v53 = vld [vmem:[%s2494_s6 + $0x8] sm:$0xff] }
 0x13c   : > { %v988_v63 = vsel %vm986_vm3, %v987_v61, %v985_v62  ;;  %v1030_v62 = vadd.f32 %v1029_v57, %v1028_v54 }
 0x13d   : > { %1047 = vxpose.xlu1.b32.start.end [1/1] (short) %v988_v63, 128  ;;  %v1031_v1 = vadd.f32 0.0001, %v1017_v60 }
 0x13f   : > { %2060 = vrsqrt.f32 %v1031_v1  ;;  %vm1035_vm5 = vcmp.eq.f32.partialorder %v1031_v1, inf  ;;  %vm1037_vm7 = vcmp.eq.f32.partialorder %v1031_v1, 0.0 }
 0x149   : > { %v2061_v8 = vpop.eup %2060 }
 0x153   : > { %2057 = vset.pattern.permute.xlu0 %v2206_v3 }
 0x15b   : > { %2056 = vset.pattern.permute.xlu1 %v2206_v3  ;;  %v1032_v3 = vadd.f32 0.0001, %v1030_v62 }
 0x15d   : > { %2062 = vrsqrt.f32 %v1032_v3  ;;  %vm1042_vm6 = vcmp.eq.f32.partialorder %v1032_v3, inf  ;;  %vm1044_vm8 = vcmp.eq.f32.partialorder %v1032_v3, 0.0 }
 0x167   : > { %v2063_v9 = vpop.eup %2062 }
 0x18e   : > { %v734_v10 = vpop.trf.xlu0 }
 0x18f   : > { %1780 = vmatmul.mubr.msk.f32.vlgmr.msra.gmra.mrb[8].mxu1 %vm750_vm4, %v734_v10  ;;  %v1034_v10 = vmul.f32 %v2061_v8, %v1031_v1 }
 0x190   : > { %869 = vmatprep.mubr.f32.mxu1 %v2205_v0 }
 0x192   : > { %v735_v11 = vpop.trf.xlu0 }
 0x193   : > { %1781 = vmatmul.mubr.msk.f32.gmra.mrb[10].mxu1 %vm750_vm4, %v735_v11  ;;  %v1041_v11 = vmul.f32 %v2063_v9, %v1032_v3  ;;  %v1289_v9 = vld [vmem:[%s2494_s6 + $0x10] sm:$0xff] }
 0x194   : > { %875 = vmatprep.mubr.f32.mxu1 %v2205_v0 }
 0x196   : > { %v736_v12 = vpop.trf.xlu0 }
 0x197   : > { %1782 = vmatmul.mubr.msk.f32.gmra.mrb[12].mxu1 %vm750_vm4, %v736_v12  ;;  %v1038_v12 = vand.u32 2147483648, %v1031_v1 }
 0x198   : > { %881 = vmatprep.mubr.f32.mxu1 %v2205_v0 }
 0x19a   : > { %v737_v13 = vpop.trf.xlu0 }
 0x19b   : > { %1783 = vmatmul.mubr.msk.f32.gmra.mrb[14].mxu1 %vm750_vm4, %v737_v13  ;;  %v1036_v13 = vsel %vm1035_vm5, %v1031_v1, %v1034_v10 }
 0x19c   : > { %887 = vmatprep.mubr.f32.mxu1 %v2205_v0 }
 0x19e   : > { %v738_v14 = vpop.trf.xlu0 }
 0x19f   : > { %1784 = vmatmul.mubr.msk.f32.gmra.mrb[16].mxu1 %vm750_vm4, %v738_v14  ;;  %v1045_v14 = vand.u32 2147483648, %v1032_v3 }
 0x1a0   : > { %893 = vmatprep.mubr.f32.mxu1 %v2205_v0 }
 0x1a2   : > { %v739_v15 = vpop.trf.xlu0 }
 0x1a3   : > { %1785 = vmatmul.mubr.msk.f32.gmra.mrb[18].mxu1 %vm750_vm4, %v739_v15  ;;  %v1043_v15 = vsel %vm1042_vm6, %v1032_v3, %v1041_v11 }
 0x1a4   : > { %899 = vmatprep.mubr.f32.mxu1 %v2205_v0 }
 0x1a6   : > { %v740_v16 = vpop.trf.xlu0 }
 0x1a7   : > { %1786 = vmatmul.mubr.msk.f32.gmra.mrb[20].mxu1 %vm750_vm4, %v740_v16 }
 0x1a8   : > { %905 = vmatprep.mubr.f32.mxu1 %v2205_v0 }
 0x1aa   : > { %v741_v17 = vpop.trf.xlu0 }
 0x1ab   : > { %1787 = vmatmul.mubr.msk.f32.gmra.mrb[22].mxu1 %vm750_vm4, %v741_v17  ;;  %v2478_v17 = vsel %vm1037_vm7, %v1038_v12, %v1036_v13 }
 0x1ac   : > { %911 = vmatprep.mubr.f32.mxu1 %v2205_v0 }
 0x1ae   : > { %v742_v18 = vpop.trf.xlu0 }
 0x1af   : > { %1788 = vmatmul.mubr.msk.f32.gmra.mrb[24].mxu1 %vm750_vm4, %v742_v18  ;;  %v2480_v18 = vsel %vm1044_vm8, %v1045_v14, %v1043_v15  ;;  %v1290_v14 = vld [vmem:[%s2494_s6 + $0x18] sm:$0xff] }
 0x1b0   : > { %917 = vmatprep.mubr.f32.mxu1 %v2205_v0 }
 0x1b2   : > { %v743_v19 = vpop.trf.xlu0 }
 0x1b3   : > { %1789 = vmatmul.mubr.msk.f32.gmra.mrb[26].mxu1 %vm750_vm4, %v743_v19 }
 0x1b4   : > { %923 = vmatprep.mubr.f32.mxu1 %v2205_v0 }
 0x1b6   : > { %v744_v20 = vpop.trf.xlu0 }
 0x1b7   : > { %1790 = vmatmul.mubr.msk.f32.gmra.mrb[28].mxu1 %vm750_vm4, %v744_v20 }
 0x1b8   : > { %929 = vmatprep.mubr.f32.mxu1 %v2205_v0 }
 0x1ba   : > { %v745_v21 = vpop.trf.xlu0 }
 0x1bb   : > { %1791 = vmatmul.mubr.msk.f32.gmra.mrb[30].mxu1 %vm750_vm4, %v745_v21 }
 0x1bc   : > { %935 = vmatprep.mubr.f32.mxu1 %v2205_v0 }
 0x1bd   : > { %v1063_v22 = vpop.trf.xlu1 }
 0x1be   : > { %v746_v23 = vpop.trf.xlu0  ;;  %1081 = vperm.xlu1 %2056, %v1063_v22  }
 0x1bf   : > { %1792 = vmatmul.mubr.msk.f32.gmra.mrb[32].mxu1 %vm750_vm4, %v746_v23 }
 0x1c0   : > { %941 = vmatprep.mubr.f32.mxu1 %v2205_v0 }
 0x1c1   : > { %v1064_v24 = vpop.trf.xlu1 }
 0x1c2   : > { %v747_v25 = vpop.trf.xlu0  ;;  %1086 = vperm.xlu0 %2057, %v1064_v24  }
 0x1c3   : > { %1793 = vmatmul.mubr.msk.f32.gmra.mrb[34].mxu1 %vm750_vm4, %v747_v25 }
 0x1c4   : > { %947 = vmatprep.mubr.f32.mxu1 %v2205_v0 }
 0x1c5   : > { %v1065_v26 = vpop.trf.xlu1 }
 0x1c6   : > { %v748_v27 = vpop.trf.xlu0  ;;  %1091 = vperm.xlu1 %2056, %v1065_v26  }
 0x1c7   : > { %1794 = vmatmul.mubr.msk.f32.gmra.mrb[36].mxu1 %vm750_vm4, %v748_v27 }
 0x1c8   : > { %953 = vmatprep.mubr.f32.mxu1 %v2205_v0 }
 0x1c9   : > { %v1066_v28 = vpop.trf.xlu1 }
 0x1ca   : > { %v749_v29 = vpop.trf.xlu0  ;;  %1096 = vperm.xlu1 %2056, %v1066_v28  }
 0x1cb   : > { %1795 = vmatmul.mubr.msk.f32.gmra.mrb[38].mxu1 %vm750_vm4, %v749_v29 }
 0x1cd   : > { %v1067_v30 = vpop.trf.xlu1 }
 0x1ce   : > { %1101 = vperm.xlu1 %2056, %v1067_v30  }
 0x1d1   : > { %v1068_v31 = vpop.trf.xlu1 }
 0x1d2   : > { %1106 = vperm.xlu0 %2057, %v1068_v31  }
 0x1d5   : > { %v1069_v32 = vpop.trf.xlu1 }
 0x1d6   : > { %1111 = vperm.xlu1 %2056, %v1069_v32  }
 0x1d9   : > { %v1070_v33 = vpop.trf.xlu1 }
 0x1da   : > { %1116 = vperm.xlu0 %2057, %v1070_v33  }
 0x1dd   : > { %v1071_v34 = vpop.trf.xlu1 }
 0x1de   : > { %1121 = vperm.xlu1 %2056, %v1071_v34  }
 0x1e1   : > { %v1072_v35 = vpop.trf.xlu1 }
 0x1e2   : > { %1126 = vperm.xlu0 %2057, %v1072_v35  }
 0x1e5   : > { %v1073_v36 = vpop.trf.xlu1 }
 0x1e6   : > { %1131 = vperm.xlu1 %2056, %v1073_v36  }
 0x1e9   : > { %v1074_v0 = vpop.trf.xlu1 }
 0x1ea   : > { %1136 = vperm.xlu0 %2057, %v1074_v0   ;;  %v2448_v44 = vpop.f32.mrb[16].mxu0 }
 0x1eb   : > { %v541_v46 = vpop.f32.mrb[17].mxu0 }
 0x1ec   : > { %1415 = vmatprep.mubr.f32.mxu0 %v541_v46 }
 0x1ed   : > { %v1075_v37 = vpop.trf.xlu1 }
 0x1ee   : > { %1141 = vperm.xlu1 %2056, %v1075_v37  }
 0x1f1   : > { %v1076_v38 = vpop.trf.xlu1 }
 0x1f2   : > { %1146 = vperm.xlu0 %2057, %v1076_v38   ;;  %v2451_v47 = vpop.f32.mrb[18].mxu0 }
 0x1f3   : > { %v2453_v49 = vpop.f32.mrb[19].mxu0 }
 0x1f5   : > { %v1077_v39 = vpop.trf.xlu1 }
 0x1f6   : > { %1151 = vperm.xlu1 %2056, %v1077_v39   ;;  %v2455_v51 = vpop.f32.mrb[20].mxu0 }
 0x1f7   : > { %v2457_v52 = vpop.f32.mrb[21].mxu0 }
 0x1f9   : > { %v1078_v40 = vpop.trf.xlu1 }
 0x1fa   : > { %1156 = vperm.xlu0 %2057, %v1078_v40   ;;  %v2459_v56 = vpop.f32.mrb[22].mxu0 }
 0x1fb   : > { %v2461_v58 = vpop.f32.mrb[23].mxu0 }
 0x1fe   : > { %v2463_v59 = vpop.f32.mrb[24].mxu0 }
 0x1ff   : > { %v2465_v61 = vpop.f32.mrb[25].mxu0 }
 0x202   : > { %v2467_v63 = vpop.f32.mrb[26].mxu0 }
 0x203   : > { %v2469_v2 = vpop.f32.mrb[27].mxu0 }
 0x206   : > { %v2471_v4 = vpop.f32.mrb[28].mxu0 }
 0x207   : > { %v577_v5 = vpop.f32.mrb[29].mxu0 }
 0x208   : > { %1445 = vmatprep.mubr.f32.mxu1 %v577_v5 }
 0x20a   : > { %v2473_v6 = vpop.f32.mrb[30].mxu0 }
 0x20b   : > { %v2475_v7 = vpop.f32.mrb[31].mxu0 }
 0x23d   : > { %v1082_v16 = vpop.permute.xlu1 %1081 }
 0x23e   : > { %v1159_v19 = vmul.f32 %v1082_v16, %v2478_v17  ;;  %v1160_v20 = vmul.f32 %v1082_v16, %v2480_v18 }
 0x240   : > { %v1191_v23 = vadd.f32 0.0001, %v1159_v19  ;;  %v1192_v25 = vadd.f32 0.0001, %v1160_v20 }
 0x241   : > { %v1087_v21 = vpop.permute.xlu0 %1086 }
 0x242   : > { %v1161_v24 = vmul.f32 %v1087_v21, %v2478_v17  ;;  %v1162_v26 = vmul.f32 %v1087_v21, %v2480_v18  ;;  %2064 = vrcp.f32 %v1191_v23 }
 0x243   : > { %2066 = vrcp.f32 %v1192_v25 }
 0x244   : > { %v1193_v28 = vadd.f32 0.0001, %v1161_v24  ;;  %v1194_v30 = vadd.f32 0.0001, %v1162_v26  ;;  %v1291_v26 = vld [vmem:[%s2494_s6 + $0x20] sm:$0xff] }
 0x245   : > { %v1092_v22 = vpop.permute.xlu1 %1091 }
 0x246   : > { %v1163_v29 = vmul.f32 %v1092_v22, %v2478_v17  ;;  %v1164_v31 = vmul.f32 %v1092_v22, %v2480_v18  ;;  %2068 = vrcp.f32 %v1193_v28 }
 0x247   : > { %2070 = vrcp.f32 %v1194_v30 }
 0x248   : > { %v1195_v32 = vadd.f32 0.0001, %v1163_v29  ;;  %v1196_v34 = vadd.f32 0.0001, %v1164_v31  ;;  %v1292_v31 = vld [vmem:[%s2494_s6 + $0x28] sm:$0xff] }
 0x249   : > { %v1097_v27 = vpop.permute.xlu1 %1096 }
 0x24a   : > { %v1165_v33 = vmul.f32 %v1097_v27, %v2478_v17  ;;  %v1166_v35 = vmul.f32 %v1097_v27, %v2480_v18  ;;  %2072 = vrcp.f32 %v1195_v32 }
 0x24b   : > { %2074 = vrcp.f32 %v1196_v34 }
 0x24c   : > { %v1197_v0 = vadd.f32 0.0001, %v1165_v33  ;;  %v1198_v39 = vadd.f32 0.0001, %v1166_v35  ;;  %v2065_v41 = vpop.eup %2064 }
 0x24d   : > { %v1102_v36 = vpop.permute.xlu1 %1101  ;;  %v2067_v45 = vpop.eup %2066 }
 0x24e   : > { %v1167_v37 = vmul.f32 %v1102_v36, %v2478_v17  ;;  %v1168_v40 = vmul.f32 %v1102_v36, %v2480_v18  ;;  %2076 = vrcp.f32 %v1197_v0 }
 0x24f   : > { %2078 = vrcp.f32 %v1198_v39 }
 0x250   : > { %v1199_v54 = vadd.f32 0.0001, %v1167_v37  ;;  %v1200_v57 = vadd.f32 0.0001, %v1168_v40  ;;  %v2069_v3 = vpop.eup %2068 }
 0x251   : > { %v1107_v38 = vpop.permute.xlu0 %1106  ;;  %v2071_v10 = vpop.eup %2070 }
 0x252   : > { %v1169_v46 = vmul.f32 %v1107_v38, %v2478_v17  ;;  %v1170_v60 = vmul.f32 %v1107_v38, %v2480_v18  ;;  %2080 = vrcp.f32 %v1199_v54 }
 0x253   : > { %2082 = vrcp.f32 %v1200_v57 }
 0x254   : > { %v1201_v11 = vadd.f32 0.0001, %v1169_v46  ;;  %v1202_v19 = vadd.f32 0.0001, %v1170_v60  ;;  %v2073_v23 = vpop.eup %2072 }
 0x255   : > { %v1112_v62 = vpop.permute.xlu1 %1111  ;;  %v2075_v27 = vpop.eup %2074 }
 0x256   : > { %v1171_v15 = vmul.f32 %v1112_v62, %v2478_v17  ;;  %v1172_v20 = vmul.f32 %v1112_v62, %v2480_v18  ;;  %2084 = vrcp.f32 %v1201_v11 }
 0x257   : > { %2086 = vrcp.f32 %v1202_v19 }
 0x258   : > { %v1203_v32 = vadd.f32 0.0001, %v1171_v15  ;;  %v1204_v36 = vadd.f32 0.0001, %v1172_v20  ;;  %v2077_v39 = vpop.eup %2076 }
 0x259   : > { %v1117_v21 = vpop.permute.xlu0 %1116 }
 0x25a   : > { %v1173_v33 = vmul.f32 %v1117_v21, %v2478_v17  ;;  %v1174_v0 = vmul.f32 %v1117_v21, %v2480_v18  ;;  %2088 = vrcp.f32 %v1203_v32  ;;  %v1298_v32 = vld [vmem:[%s2494_s6 + $0x58] sm:$0xff] }
 0x25b   : > { %2090 = vrcp.f32 %v1204_v36 }
 0x25c   : > { %v1206_v57 = vadd.f32 0.0001, %v1174_v0 }
 0x25d   : > { %v1122_v37 = vpop.permute.xlu1 %1121 }
 0x25e   : > { %v1176_v60 = vmul.f32 %v1122_v37, %v2480_v18 }
 0x260   : > { %v1208_v21 = vadd.f32 0.0001, %v1176_v60 }
 0x261   : > { %v1127_v54 = vpop.permute.xlu0 %1126 }
 0x262   : > { %v865_v42 = vpop.f32.mrb[8].mxu1 }
 0x263   : > { %v1255_v48 = vmul.f32 %v2065_v41, %v865_v42  ;;  %v867_v50 = vpop.f32.mrb[9].mxu1  ;;  %v1293_v42 = vld [vmem:[%s2494_s6 + $0x30] sm:$0xff] }
 0x264   : > { %v1256_v55 = vmul.f32 %v2067_v45, %v867_v50  ;;  %v1205_v50 = vadd.f32 0.0001, %v1173_v33 }
 0x265   : > { %v1319_v1 = vmul.f32 %v1287_v43, %v1255_v48  ;;  %v2079_v43 = vpop.eup %2078  ;;  %v1294_v48 = vld [vmem:[%s2494_s6 + $0x38] sm:$0xff] }
 0x266   : > { %v1320_v5 = vmul.f32 %v1288_v53, %v1256_v55  ;;  %v871_v8 = vpop.f32.mrb[10].mxu1  ;;  %v1175_v53 = vmul.f32 %v1122_v37, %v2478_v17  ;;  %2092 = vrcp.f32 %v1205_v50 }
 0x267   : > { %v1257_v12 = vmul.f32 %v2069_v3, %v871_v8  ;;  %v873_v13 = vpop.f32.mrb[11].mxu1  ;;  %v1295_v8 = vld [vmem:[%s2494_s6 + $0x40] sm:$0xff]  ;;  %2094 = vrcp.f32 %v1206_v57 }
 0x268   : > { %v1258_v16 = vmul.f32 %v2071_v10, %v873_v13  ;;  %v1177_v10 = vmul.f32 %v1127_v54, %v2478_v17  ;;  %v1207_v15 = vadd.f32 0.0001, %v1175_v53 }
 0x269   : > { %v1321_v22 = vmul.f32 %v1289_v9, %v1257_v12  ;;  %v1137_v0 = vpop.permute.xlu0 %1136 }
 0x26a   : > { %v1322_v24 = vmul.f32 %v1290_v14, %v1258_v16  ;;  %v877_v25 = vpop.f32.mrb[12].mxu1  ;;  %v1296_v14 = vld [vmem:[%s2494_s6 + $0x48] sm:$0xff]  ;;  %2096 = vrcp.f32 %v1207_v15  ;;  %v1181_v53 = vmul.f32 %v1137_v0, %v2478_v17  ;;  %v1182_v60 = vmul.f32 %v1137_v0, %v2480_v18 }
 0x26b   : > { %v1907_v28 = vpack.c.bf16 %v1321_v22, %v1319_v1  ;;  %v1259_v29 = vmul.f32 %v2073_v23, %v877_v25  ;;  %v879_v30 = vpop.f32.mrb[13].mxu1  ;;  %v2081_v1 = vpop.eup %2080  ;;  %v1178_v22 = vmul.f32 %v1127_v54, %v2480_v18  ;;  %2098 = vrcp.f32 %v1208_v21 }
 0x26c   : > { %v1260_v34 = vmul.f32 %v2075_v27, %v879_v30  ;;  %v1905_v35 = vpack.c.bf16 %v1322_v24, %v1320_v5  ;;  %v2083_v9 = vpop.eup %2082  ;;  %v1132_v23 = vpop.permute.xlu1 %1131  ;;  %v1297_v27 = vld [vmem:[%s2494_s6 + $0x50] sm:$0xff] }
 0x26d   : > { %v1323_v38 = vmul.f32 %v1291_v26, %v1259_v29  ;;  %v2085_v20 = vpop.eup %2084  ;;  %v1209_v29 = vadd.f32 0.0001, %v1177_v10  ;;  %v1179_v33 = vmul.f32 %v1132_v23, %v2478_v17  ;;  %v1180_v36 = vmul.f32 %v1132_v23, %v2480_v18 }
 0x26e   : > { %v1324_v40 = vmul.f32 %v1292_v31, %v1260_v34  ;;  %v883_v41 = vpop.f32.mrb[14].mxu1  ;;  %1906 = vmatprep.subr.bf16.mxu0 %v1905_v35  ;;  %1969 = vmatprep.subr.bf16.mxu1 %v1905_v35  ;;  %v1210_v35 = vadd.f32 0.0001, %v1178_v22 }
 0x26f   : > { %v1261_v45 = vmul.f32 %v2077_v39, %v883_v41  ;;  %v885_v46 = vpop.f32.mrb[15].mxu1  ;;  %1908 = vmatpush1.bf16.xpose.msra.mxu0 %v1907_v28  ;;  %1977 = vmatpush1.bf16.xpose.msra.mxu1 %v1907_v28  ;;  %v2087_v28 = vpop.eup %2086  ;;  %v1299_v41 = vld [vmem:[%s2494_s6 + $0x60] sm:$0xff]  ;;  %2100 = vrcp.f32 %v1209_v29  ;;  %v1211_v50 = vadd.f32 0.0001, %v1179_v33  ;;  %v1212_v57 = vadd.f32 0.0001, %v1180_v36 }
 0x270   : > { %v1262_v55 = vmul.f32 %v2079_v43, %v885_v46  ;;  %2102 = vrcp.f32 %v1210_v35 }
 0x271   : > { %v1325_v62 = vmul.f32 %v1293_v42, %v1261_v45  ;;  %2104 = vrcp.f32 %v1211_v50  ;;  %v1306_v50 = vld [vmem:[%s2494_s6 + $0x98] sm:$0xff] }
 0x272   : > { %v1326_v3 = vmul.f32 %v1294_v48, %v1262_v55  ;;  %v889_v5 = vpop.f32.mrb[16].mxu1  ;;  %v1300_v48 = vld [vmem:[%s2494_s6 + $0x68] sm:$0xff]  ;;  %2106 = vrcp.f32 %v1212_v57 }
 0x273   : > { %v1911_v11 = vpack.c.bf16 %v1325_v62, %v1323_v38  ;;  %v1263_v12 = vmul.f32 %v2081_v1, %v889_v5  ;;  %v891_v13 = vpop.f32.mrb[17].mxu1  ;;  %v2089_v38 = vpop.eup %2088 }
 0x274   : > { %v1264_v16 = vmul.f32 %v2083_v9, %v891_v13  ;;  %v1909_v19 = vpack.c.bf16 %v1326_v3, %v1324_v40  ;;  %v2091_v42 = vpop.eup %2090  ;;  %v1142_v62 = vpop.permute.xlu1 %1141  ;;  %v1301_v9 = vld [vmem:[%s2494_s6 + $0x70] sm:$0xff]  ;;  %v1302_v13 = vld [vmem:[%s2494_s6 + $0x78] sm:$0xff] }
 0x275   : > { %v1327_v24 = vmul.f32 %v1295_v8, %v1263_v12  ;;  %v2093_v3 = vpop.eup %2092  ;;  %v1183_v15 = vmul.f32 %v1142_v62, %v2478_v17  ;;  %v1184_v21 = vmul.f32 %v1142_v62, %v2480_v18 }
 0x276   : > { %v1328_v25 = vmul.f32 %v1296_v14, %v1264_v16  ;;  %v895_v26 = vpop.f32.mrb[18].mxu1  ;;  %1910 = vmatprep.subr.bf16.mxu0 %v1909_v19  ;;  %1970 = vmatprep.subr.bf16.mxu1 %v1909_v19  ;;  %v2095_v10 = vpop.eup %2094  ;;  %v1213_v14 = vadd.f32 0.0001, %v1181_v53 }
 0x277   : > { %v1265_v30 = vmul.f32 %v2085_v20, %v895_v26  ;;  %v897_v31 = vpop.f32.mrb[19].mxu1  ;;  %1912 = vmatpush1.bf16.xpose.msra.mxu0 %v1911_v11  ;;  %1978 = vmatpush1.bf16.xpose.msra.mxu1 %v1911_v11  ;;  %v1147_v16 = vpop.permute.xlu0 %1146  ;;  %v1214_v20 = vadd.f32 0.0001, %v1182_v60  ;;  %v1303_v26 = vld [vmem:[%s2494_s6 + $0x80] sm:$0xff]  ;;  %v1215_v33 = vadd.f32 0.0001, %v1183_v15 }
 0x278   : > { %v1266_v34 = vmul.f32 %v2087_v28, %v897_v31  ;;  %v2097_v23 = vpop.eup %2096  ;;  %v1185_v28 = vmul.f32 %v1147_v16, %v2478_v17  ;;  %2108 = vrcp.f32 %v1213_v14  ;;  %v1216_v0 = vadd.f32 0.0001, %v1184_v21 }
 0x279   : > { %v1329_v37 = vmul.f32 %v1297_v27, %v1265_v30  ;;  %v2099_v27 = vpop.eup %2098  ;;  %2110 = vrcp.f32 %v1214_v20 }
 0x27a   : > { %v1330_v39 = vmul.f32 %v1298_v32, %v1266_v34  ;;  %v901_v40 = vpop.f32.mrb[20].mxu1  ;;  %v1304_v32 = vld [vmem:[%s2494_s6 + $0x88] sm:$0xff]  ;;  %v2101_v36 = vpop.eup %2100  ;;  %2112 = vrcp.f32 %v1215_v33 }
 0x27b   : > { %v1915_v43 = vpack.c.bf16 %v1329_v37, %v1327_v24  ;;  %v1267_v45 = vmul.f32 %v2089_v38, %v901_v40  ;;  %v903_v46 = vpop.f32.mrb[21].mxu1  ;;  %v1186_v37 = vmul.f32 %v1147_v16, %v2480_v18  ;;  %v1152_v38 = vpop.permute.xlu1 %1151  ;;  %2114 = vrcp.f32 %v1216_v0 }
 0x27c   : > { %v1268_v54 = vmul.f32 %v2091_v42, %v903_v46  ;;  %v1913_v55 = vpack.c.bf16 %v1330_v39, %v1328_v25  ;;  %v1305_v42 = vld [vmem:[%s2494_s6 + $0x90] sm:$0xff]  ;;  %v1187_v53 = vmul.f32 %v1152_v38, %v2478_v17  ;;  %v1188_v57 = vmul.f32 %v1152_v38, %v2480_v18  ;;  %v1157_v60 = vpop.permute.xlu0 %1156 }
 0x27d   : > { %v1331_v1 = vmul.f32 %v1299_v41, %v1267_v45  ;;  %v1217_v45 = vadd.f32 0.0001, %v1185_v28  ;;  %v1189_v15 = vmul.f32 %v1157_v60, %v2478_v17  ;;  %v1190_v21 = vmul.f32 %v1157_v60, %v2480_v18 }
 0x27e   : > { %v1332_v5 = vmul.f32 %v1300_v48, %v1268_v54  ;;  %v907_v8 = vpop.f32.mrb[22].mxu1  ;;  %1914 = vmatprep.subr.bf16.mxu0 %v1913_v55  ;;  %1971 = vmatprep.subr.bf16.mxu1 %v1913_v55  ;;  %v1218_v55 = vadd.f32 0.0001, %v1186_v37  ;;  %v1219_v14 = vadd.f32 0.0001, %v1187_v53 }
 0x27f   : > { %v1269_v11 = vmul.f32 %v2093_v3, %v907_v8  ;;  %v909_v12 = vpop.f32.mrb[23].mxu1  ;;  %1916 = vmatpush1.bf16.xpose.msra.mxu0 %v1915_v43  ;;  %1979 = vmatpush1.bf16.xpose.msra.mxu1 %v1915_v43  ;;  %v2103_v43 = vpop.eup %2102  ;;  %v1307_v8 = vld [vmem:[%s2494_s6 + $0xa0] sm:$0xff]  ;;  %2116 = vrcp.f32 %v1217_v45  ;;  %v1220_v20 = vadd.f32 0.0001, %v1188_v57  ;;  %v1221_v17 = vadd.f32 0.0001, %v1189_v15 }
 0x280   : > { %v1270_v19 = vmul.f32 %v2095_v10, %v909_v12  ;;  %2118 = vrcp.f32 %v1218_v55  ;;  %v1222_v18 = vadd.f32 0.0001, %v1190_v21  ;;  %v1314_v57 = vld [vmem:[%s2494_s6 + $0xd8] sm:$0xff] }
 0x281   : > { %v1333_v22 = vmul.f32 %v1301_v9, %v1269_v11  ;;  %2120 = vrcp.f32 %v1219_v14 }
 0x282   : > { %v1334_v24 = vmul.f32 %v1302_v13, %v1270_v19  ;;  %v913_v25 = vpop.f32.mrb[24].mxu1  ;;  %v1308_v13 = vld [vmem:[%s2494_s6 + $0xa8] sm:$0xff]  ;;  %2122 = vrcp.f32 %v1220_v20 }
 0x283   : > { %v1919_v29 = vpack.c.bf16 %v1333_v22, %v1331_v1  ;;  %v1271_v30 = vmul.f32 %v2097_v23, %v913_v25  ;;  %v915_v31 = vpop.f32.mrb[25].mxu1  ;;  %v2105_v1 = vpop.eup %2104  ;;  %2124 = vrcp.f32 %v1221_v17 }
 0x284   : > { %v1272_v34 = vmul.f32 %v2099_v27, %v915_v31  ;;  %v1917_v35 = vpack.c.bf16 %v1334_v24, %v1332_v5  ;;  %v2107_v9 = vpop.eup %2106  ;;  %2126 = vrcp.f32 %v1222_v18 }
 0x285   : > { %v1335_v39 = vmul.f32 %v1303_v26, %v1271_v30  ;;  %v2109_v23 = vpop.eup %2108  ;;  %v1309_v26 = vld [vmem:[%s2494_s6 + $0xb0] sm:$0xff]  ;;  %v1310_v30 = vld [vmem:[%s2494_s6 + $0xb8] sm:$0xff] }
 0x286   : > { %v1336_v40 = vmul.f32 %v1304_v32, %v1272_v34  ;;  %v919_v41 = vpop.f32.mrb[26].mxu1  ;;  %1918 = vmatprep.subr.bf16.mxu0 %v1917_v35  ;;  %1972 = vmatprep.subr.bf16.mxu1 %v1917_v35  ;;  %v2111_v27 = vpop.eup %2110 }
 0x287   : > { %v1273_v46 = vmul.f32 %v2101_v36, %v919_v41  ;;  %v921_v48 = vpop.f32.mrb[27].mxu1  ;;  %1920 = vmatpush1.bf16.xpose.msra.mxu0 %v1919_v29  ;;  %1980 = vmatpush1.bf16.xpose.msra.mxu1 %v1919_v29  ;;  %v2113_v33 = vpop.eup %2112  ;;  %v1311_v36 = vld [vmem:[%s2494_s6 + $0xc0] sm:$0xff] }
 0x288   : > { %v1274_v54 = vmul.f32 %v2103_v43, %v921_v48  ;;  %v2115_v0 = vpop.eup %2114 }
 0x289   : > { %v1337_v62 = vmul.f32 %v1305_v42, %v1273_v46  ;;  %v2117_v43 = vpop.eup %2116 }
 0x28a   : > { %v1338_v3 = vmul.f32 %v1306_v50, %v1274_v54  ;;  %v925_v5 = vpop.f32.mrb[28].mxu1  ;;  %v1313_v50 = vld [vmem:[%s2494_s6 + $0xd0] sm:$0xff]  ;;  %v2119_v53 = vpop.eup %2118 }
 0x28b   : > { %v1923_v10 = vpack.c.bf16 %v1337_v62, %v1335_v39  ;;  %v1275_v11 = vmul.f32 %v2105_v1, %v925_v5  ;;  %v927_v12 = vpop.f32.mrb[29].mxu1  ;;  %v2121_v1 = vpop.eup %2120 }
 0x28c   : > { %v1276_v16 = vmul.f32 %v2107_v9, %v927_v12  ;;  %v1921_v19 = vpack.c.bf16 %v1338_v3, %v1336_v40  ;;  %v1312_v40 = vld [vmem:[%s2494_s6 + $0xc8] sm:$0xff]  ;;  %v2123_v9 = vpop.eup %2122 }
 0x28d   : > { %v1339_v22 = vmul.f32 %v1307_v8, %v1275_v11  ;;  %v1315_v8 = vld [vmem:[%s2494_s6 + $0xe0] sm:$0xff] }
 0x28e   : > { %v1340_v24 = vmul.f32 %v1308_v13, %v1276_v16  ;;  %v931_v25 = vpop.f32.mrb[30].mxu1  ;;  %1922 = vmatprep.subr.bf16.mxu0 %v1921_v19  ;;  %1973 = vmatprep.subr.bf16.mxu1 %v1921_v19  ;;  %v1316_v13 = vld [vmem:[%s2494_s6 + $0xe8] sm:$0xff]  ;;  %v2125_v19 = vpop.eup %2124 }
 0x28f   : > { %v1277_v28 = vmul.f32 %v2109_v23, %v931_v25  ;;  %v933_v29 = vpop.f32.mrb[31].mxu1  ;;  %1924 = vmatpush1.bf16.xpose.msra.mxu0 %v1923_v10  ;;  %1981 = vmatpush1.bf16.xpose.msra.mxu1 %v1923_v10  ;;  %v2127_v23 = vpop.eup %2126 }
 0x290   : > { %v1278_v31 = vmul.f32 %v2111_v27, %v933_v29 }
 0x291   : > { %v1341_v32 = vmul.f32 %v1309_v26, %v1277_v28  ;;  %v1318_v26 = vld [vmem:[%s2494_s6 + $0xf8] sm:$0xff] }
 0x292   : > { %v1342_v34 = vmul.f32 %v1310_v30, %v1278_v31  ;;  %v937_v35 = vpop.f32.mrb[32].mxu1 }
 0x293   : > { %v1927_v37 = vpack.c.bf16 %v1341_v32, %v1339_v22  ;;  %v1279_v38 = vmul.f32 %v2113_v33, %v937_v35  ;;  %v939_v39 = vpop.f32.mrb[33].mxu1  ;;  %v1317_v22 = vld [vmem:[%s2494_s6 + $0xf0] sm:$0xff] }
 0x294   : > { %v1280_v41 = vmul.f32 %v2115_v0, %v939_v39  ;;  %v1925_v42 = vpack.c.bf16 %v1342_v34, %v1340_v24 }
 0x295   : > { %v1343_v45 = vmul.f32 %v1311_v36, %v1279_v38 }
 0x296   : > { %v1344_v46 = vmul.f32 %v1312_v40, %v1280_v41  ;;  %v943_v48 = vpop.f32.mrb[34].mxu1  ;;  %1926 = vmatprep.subr.bf16.mxu0 %v1925_v42  ;;  %1974 = vmatprep.subr.bf16.mxu1 %v1925_v42 }
 0x297   : > { %v1281_v54 = vmul.f32 %v2117_v43, %v943_v48  ;;  %v945_v55 = vpop.f32.mrb[35].mxu1  ;;  %1928 = vmatpush1.bf16.xpose.msra.mxu0 %v1927_v37  ;;  %1982 = vmatpush1.bf16.xpose.msra.mxu1 %v1927_v37 }
 0x298   : > { %v1282_v60 = vmul.f32 %v2119_v53, %v945_v55 }
 0x299   : > { %v1345_v62 = vmul.f32 %v1313_v50, %v1281_v54 }
 0x29a   : > { %v1346_v3 = vmul.f32 %v1314_v57, %v1282_v60  ;;  %v949_v5 = vpop.f32.mrb[36].mxu1 }
 0x29b   : > { %v1931_v10 = vpack.c.bf16 %v1345_v62, %v1343_v45  ;;  %v1283_v11 = vmul.f32 %v2121_v1, %v949_v5  ;;  %v951_v12 = vpop.f32.mrb[37].mxu1  ;;  %v1470_v5 = vld [vmem:[%s2596_s3] sm:$0xff] (!%p1797_p5) }
 0x29c   : > { %v1284_v14 = vmul.f32 %v2123_v9, %v951_v12  ;;  %v1929_v15 = vpack.c.bf16 %v1346_v3, %v1344_v46 }
 0x29d   : > { %v1347_v16 = vmul.f32 %v1315_v8, %v1283_v11  ;;  %v1504_v8 = vcombine.high (!%p1797_p5), %v1470_v5, %v1470_v5 }
 0x29e   : > { %v1348_v20 = vmul.f32 %v1316_v13, %v1284_v14  ;;  %v955_v21 = vpop.f32.mrb[38].mxu1  ;;  %1930 = vmatprep.subr.bf16.mxu0 %v1929_v15  ;;  %1975 = vmatprep.subr.bf16.mxu1 %v1929_v15 }
 0x29f   : > { %v1285_v24 = vmul.f32 %v2125_v19, %v955_v21  ;;  %v957_v25 = vpop.f32.mrb[39].mxu1  ;;  %1932 = vmatpush1.bf16.xpose.msra.mxu0 %v1931_v10  ;;  %1983 = vmatpush1.bf16.xpose.msra.mxu1 %v1931_v10 }
 0x2a0   : > { %v1286_v27 = vmul.f32 %v2127_v23, %v957_v25 }
 0x2a1   : > { %v1349_v28 = vmul.f32 %v1317_v22, %v1285_v24 }
 0x2a2   : > { %v1350_v29 = vmul.f32 %v1318_v26, %v1286_v27 }
 0x2a3   : > { %v1935_v30 = vpack.c.bf16 %v1349_v28, %v1347_v16 }
 0x2a4   : > { %v1933_v17 = vpack.c.bf16 %v1350_v29, %v1348_v20 }
 0x2a6   : > { %1934 = vmatprep.subr.bf16.mxu0 %v1933_v17  ;;  %1976 = vmatprep.subr.bf16.mxu1 %v1933_v17 }
 0x2a7   : > { %1936 = vmatpush1.bf16.xpose.msra.mxu0 %v1935_v30  ;;  %1984 = vmatpush1.bf16.xpose.msra.mxu1 %v1935_v30 }
 0x2ae   : > { %1416 = vmatmul.mubr.f32.vlgmr.msra.gmra.mrb[32].mxu0 %v2448_v44  ;;  %1446 = vmatmul.mubr.f32.vlgmr.msra.gmra.mrb[40].mxu1 %v2471_v4 }
 0x2af   : > { %1420 = vmatprep.mubr.f32.mxu0 %v2453_v49  ;;  %1450 = vmatprep.mubr.f32.mxu1 %v2475_v7 }
 0x2b2   : > { %1421 = vmatmul.mubr.f32.gmra.mrb[34].mxu0 %v2451_v47  ;;  %1451 = vmatmul.mubr.f32.gmra.mrb[42].mxu1 %v2473_v6 }
 0x2b3   : > { %1425 = vmatprep.mubr.f32.mxu0 %v2457_v52 }
 0x2b6   : > { %1426 = vmatmul.mubr.f32.gmra.mrb[36].mxu0 %v2455_v51 }
 0x2b7   : > { %1430 = vmatprep.mubr.f32.mxu0 %v2461_v58 }
 0x2ba   : > { %1431 = vmatmul.mubr.f32.gmra.mrb[38].mxu0 %v2459_v56 }
 0x2bb   : > { %1435 = vmatprep.mubr.f32.mxu0 %v2465_v61 }
 0x2be   : > { %1436 = vmatmul.mubr.f32.gmra.mrb[40].mxu0 %v2463_v59 }
 0x2bf   : > { %1440 = vmatprep.mubr.f32.mxu0 %v2469_v2 }
 0x2c2   : > { %1441 = vmatmul.mubr.f32.gmra.mrb[42].mxu0 %v2467_v63 }
 0x2c3   : > { %1570 = vmatprep.mubr.f32.mxu0 (!%p1797_p5), %v1504_v8 }
 0x381   : > { %v1417_v44 = vpop.f32.mrb[32].mxu0  ;;  %v1447_v47 = vpop.f32.mrb[40].mxu1 }
 0x382   : > { %1458 = vst [vmem:[%s1457_s8] sm:$0xff] %v1417_v44  ;;  %v1419_v49 = vpop.f32.mrb[33].mxu0  ;;  %1464 = vst [vmem:[%s1457_s8 + $0x30] sm:$0xff] %v1447_v47  ;;  %v1449_v51 = vpop.f32.mrb[41].mxu1 }
 0x383   : > { %v1576_v49 = vlaneseq (!%p1797_p5) }
 0x385   : > { %v1422_v52 = vpop.f32.mrb[34].mxu0  ;;  %v1452_v58 = vpop.f32.mrb[42].mxu1  ;;  %v1577_v51 = vshrl.u32 (!%p1797_p5), %v1576_v49, 7 }
 0x386   : > { %1459 = vst [vmem:[%s1457_s8 + $0x8] sm:$0xff] %v1422_v52  ;;  %v1424_v56 = vpop.f32.mrb[35].mxu0  ;;  %1465 = vst [vmem:[%s1457_s8 + $0x38] sm:$0xff] %v1452_v58  ;;  %v1454_v61 = vpop.f32.mrb[43].mxu1 }
 0x387   : > { %v1580_v56 = vstv (!%p1797_p5), %s1579_s10  ;;  %vm1578_vm9 = vcmp.eq.s32.totalorder (!%p1797_p5), %v1577_v51, 0  ;;  %vm1583_vm10 = vcmp.eq.s32.totalorder (!%p1797_p5), %v1577_v51, 1  ;;  %vm1588_vm11 = vcmp.eq.s32.totalorder (!%p1797_p5), %v1577_v51, 2 }
 0x388   : > { %vm1593_vm12 = vcmp.eq.s32.totalorder (!%p1797_p5), %v1577_v51, 3 }
 0x389   : > { %v1427_v4 = vpop.f32.mrb[36].mxu0 }
 0x38a   : > { %1460 = vst [vmem:[%s1457_s8 + $0x10] sm:$0xff] %v1427_v4  ;;  %v1429_v59 = vpop.f32.mrb[37].mxu0 }
 0x38b   : > { %v1585_v59 = vstv (!%p1797_p5), %s1798_s11 }
 0x38d   : > { %v1432_v2 = vpop.f32.mrb[38].mxu0 }
 0x38e   : > { %1461 = vst [vmem:[%s1457_s8 + $0x18] sm:$0xff] %v1432_v2  ;;  %v1434_v63 = vpop.f32.mrb[39].mxu0 }
 0x390   : > { %1469 = sbr.rel (%p1797_p5) target bundleno = 1190 (0x4a6), region = 48 }
 0x391   : > { %v1437_v6 = vpop.f32.mrb[40].mxu0 }
 0x392   : > { %1462 = vst [vmem:[%s1457_s8 + $0x20] sm:$0xff] %v1437_v6  ;;  %v1439_v7 = vpop.f32.mrb[41].mxu0  ;;  %v1590_v6 = vstv (!%p1797_p5), %s1799_s12 }
 0x395   : > { %v1442_v31 = vpop.f32.mrb[42].mxu0 }
 0x396   : > { %1463 = vst [vmem:[%s1457_s8 + $0x28] sm:$0xff] %v1442_v31  ;;  %v1444_v18 = vpop.f32.mrb[43].mxu0 }
 0x397   : > { %v1595_v18 = vstv %s1800_s13 }
 0x39d   : > { %v1487_v32 = vld [vmem:[#allocation2 + $0x80] sm:$0xff]  ;;  %v1488_v33 = vld [vmem:[#allocation2 + $0x88] sm:$0xff]  ;;  %v1489_v0 = vld [vmem:[#allocation2 + $0x90] sm:$0xff] }
 0x39e   : > { %v1471_v34 = vld [vmem:[#allocation2] sm:$0xff]  ;;  %v1937_v35 = vpack.c.bf16 %v1488_v33, %v1487_v32  ;;  %v1472_v36 = vld [vmem:[#allocation2 + $0x8] sm:$0xff]  ;;  %v1490_v37 = vld [vmem:[#allocation2 + $0x98] sm:$0xff] }
 0x39f   : > { %v1939_v38 = vpack.c.bf16 %v1472_v36, %v1471_v34  ;;  %v1941_v39 = vpack.c.bf16 %v1490_v37, %v1489_v0  ;;  %v1473_v40 = vld [vmem:[#allocation2 + $0x10] sm:$0xff]  ;;  %v1474_v41 = vld [vmem:[#allocation2 + $0x18] sm:$0xff]  ;;  %v1491_v42 = vld [vmem:[#allocation2 + $0xa0] sm:$0xff] }
 0x3a0   : > { %1938 = vmatprep.subr.bf16.mxu0 %v1937_v35  ;;  %v1492_v43 = vld [vmem:[#allocation2 + $0xa8] sm:$0xff]  ;;  %v1943_v45 = vpack.c.bf16 %v1474_v41, %v1473_v40  ;;  %v1475_v48 = vld [vmem:[#allocation2 + $0x20] sm:$0xff]  ;;  %v1493_v53 = vld [vmem:[#allocation2 + $0xb0] sm:$0xff] }
 0x3a1   : > { %1940 = vmatpush3.bf16.msra.mxu0 %v1939_v38  ;;  %v1945_v46 = vpack.c.bf16 %v1492_v43, %v1491_v42  ;;  %v1476_v50 = vld [vmem:[#allocation2 + $0x28] sm:$0xff]  ;;  %v1494_v54 = vld [vmem:[#allocation2 + $0xb8] sm:$0xff]  ;;  %v1477_v60 = vld [vmem:[#allocation2 + $0x30] sm:$0xff] }
 0x3a2   : > { %1942 = vmatprep.subr.bf16.mxu0 %v1941_v39  ;;  %v1947_v55 = vpack.c.bf16 %v1476_v50, %v1475_v48  ;;  %v1949_v57 = vpack.c.bf16 %v1494_v54, %v1493_v53  ;;  %v1478_v62 = vld [vmem:[#allocation2 + $0x38] sm:$0xff]  ;;  %v1495_v1 = vld [vmem:[#allocation2 + $0xc0] sm:$0xff]  ;;  %v1496_v3 = vld [vmem:[#allocation2 + $0xc8] sm:$0xff] }
 0x3a3   : > { %v1951_v9 = vpack.c.bf16 %v1478_v62, %v1477_v60  ;;  %v1953_v10 = vpack.c.bf16 %v1496_v3, %v1495_v1  ;;  %v1479_v11 = vld [vmem:[#allocation2 + $0x40] sm:$0xff]  ;;  %v1480_v12 = vld [vmem:[#allocation2 + $0x48] sm:$0xff]  ;;  %v1497_v13 = vld [vmem:[#allocation2 + $0xd0] sm:$0xff] }
 0x3a4   : > { %v1498_v14 = vld [vmem:[#allocation2 + $0xd8] sm:$0xff]  ;;  %v1955_v15 = vpack.c.bf16 %v1480_v12, %v1479_v11  ;;  %v1481_v19 = vld [vmem:[#allocation2 + $0x50] sm:$0xff]  ;;  %v1499_v21 = vld [vmem:[#allocation2 + $0xe0] sm:$0xff] }
 0x3a5   : > { %1944 = vmatpush3.bf16.msra.mxu0 %v1943_v45  ;;  %v1957_v16 = vpack.c.bf16 %v1498_v14, %v1497_v13  ;;  %v1482_v20 = vld [vmem:[#allocation2 + $0x58] sm:$0xff]  ;;  %v1500_v22 = vld [vmem:[#allocation2 + $0xe8] sm:$0xff]  ;;  %v1483_v25 = vld [vmem:[#allocation2 + $0x60] sm:$0xff] }
 0x3a6   : > { %1946 = vmatprep.subr.bf16.mxu0 %v1945_v46  ;;  %v1959_v23 = vpack.c.bf16 %v1482_v20, %v1481_v19  ;;  %v1961_v24 = vpack.c.bf16 %v1500_v22, %v1499_v21  ;;  %v1484_v26 = vld [vmem:[#allocation2 + $0x68] sm:$0xff]  ;;  %v1501_v27 = vld [vmem:[#allocation2 + $0xf0] sm:$0xff]  ;;  %v1502_v28 = vld [vmem:[#allocation2 + $0xf8] sm:$0xff] }
 0x3a7   : > { %v1963_v29 = vpack.c.bf16 %v1484_v26, %v1483_v25  ;;  %v1965_v30 = vpack.c.bf16 %v1502_v28, %v1501_v27  ;;  %v1485_v17 = vld [vmem:[#allocation2 + $0x70] sm:$0xff]  ;;  %v1486_v44 = vld [vmem:[#allocation2 + $0x78] sm:$0xff] }
 0x3a8   : > { %v1967_v47 = vpack.c.bf16 %v1486_v44, %v1485_v17 }
 0x3a9   : > { %1948 = vmatpush3.bf16.msra.mxu0 %v1947_v55 }
 0x3aa   : > { %1950 = vmatprep.subr.bf16.mxu0 %v1949_v57 }
 0x3ad   : > { %1952 = vmatpush3.bf16.msra.mxu0 %v1951_v9 }
 0x3ae   : > { %1954 = vmatprep.subr.bf16.mxu0 %v1953_v10 }
 0x3b1   : > { %1956 = vmatpush3.bf16.msra.mxu0 %v1955_v15 }
 0x3b2   : > { %1958 = vmatprep.subr.bf16.mxu0 %v1957_v16 }
 0x3b5   : > { %1960 = vmatpush3.bf16.msra.mxu0 %v1959_v23 }
 0x3b6   : > { %1962 = vmatprep.subr.bf16.mxu0 %v1961_v24 }
 0x3b9   : > { %1964 = vmatpush3.bf16.msra.mxu0 %v1963_v29 }
 0x3ba   : > { %1966 = vmatprep.subr.bf16.mxu0 %v1965_v30 }
 0x3bd   : > { %1968 = vmatpush3.bf16.msra.mxu0 %v1967_v47 }
 0x3c0   : > { %1571 = vmatmul.mubr.f32.vlgmr.msra.gmra.mrb[0].mxu0 %v1470_v5 }
 0x493   : > { %v1848_v52 = vpop.f32.mrb[0].mxu0 }
 0x494   : > { %v1849_v58 = vpop.f32.mrb[1].mxu0 }
 0x495   : > { %v1850_v61 = vadd.f32 %v1849_v58, %v1848_v52 }
 0x497   : > { %v1581_v4 = vadd.f32 %v1850_v61, %v1580_v56 }
 0x499   : > { %v1582_v2 = vsel %vm1578_vm9, %v1581_v4, %v1850_v61 }
 0x49a   : > { %v1586_v63 = vadd.f32 %v1585_v59, %v1582_v2 }
 0x49c   : > { %v1587_v7 = vsel %vm1583_vm10, %v1586_v63, %v1582_v2 }
 0x49d   : > { %v1591_v31 = vadd.f32 %v1590_v6, %v1587_v7 }
 0x49f   : > { %v1592_v32 = vsel %vm1588_vm11, %v1591_v31, %v1587_v7 }
 0x4a0   : > { %v1596_v33 = vadd.f32 %v1595_v18, %v1592_v32 }
 0x4a2   : > { %v1597_v34 = vsel %vm1593_vm12, %v1596_v33, %v1592_v32 }
 0x4a3   : > { %v1598_v35 = vmax.f32 %v1597_v34, 0.0 }
 0x4a5   : > { %1599 = vst [vmem:[%s2322_s20] sm:$0xf] %v1598_v35 }
 0x4a6 PF: > { %s16_s24 = sadd.s32 1, %s2202_s24   ;;  %s2601_s18 = smov %s2190_s21 }
 0x4a7   : > { %p13_p8 = scmp.ge.s32.totalorder %s16_s24, 18   ;;  %s2602_s19 = smov %s2194_s22 }
 0x4a8   : > { %s2603_s20 = smov %s2198_s23  ;;  %s2604_s21 = smov %s2608_s26 }
 0x4a9   : > { %s2605_s22 = smov %s2612_s27  ;;  %s2606_s23 = smov %s2616_s28 }
 0x4aa   :  { %15 = sbr.rel (!%p13_p8) target bundleno = 4 (0x4), region = 87 }
 0x4b1   :  { %1627 = vsyncpa [#allocation4], 1 }
 0x4b2   :  { %1629 = vsyncpa [#allocation4 + $0x1], 1 }

</bundles_post_ra>
